<compile_context>
chip_gen: v6e
topology: v6e:2x2x1
jax: 0.10.0
libtpu: 0.0.40
codegen_flags: <defaults>
</compile_context>

<pallas_src>
import functools

import jax
import jax.numpy as jnp
from jax.experimental import pallas as pl
from jax.experimental.pallas import tpu as pltpu

_EPS = 1e-5
_LANE = 128           # output channels padded to the TPU lane width
_EPI_MAX_ROWS = 2048  # epilogue M-tile upper bound (streaming, ~1 MiB/buffer)
_ROW_ALIGN = 16       # bf16 sublane packing


def _round_up(x, m):
    return (x + m - 1) // m * m


def _cdiv(a, b):
    return (a + b - 1) // b


def _vmem_limit_bytes():
    # v5e / v6e have 128 MiB of VMEM, v7x only 64 MiB: size the scoped limit
    # per generation instead of a one-size v7x-safe cap.
    cap = 64 * 1024 * 1024
    try:
        cap = getattr(pltpu.get_tpu_info(), "vmem_capacity_bytes", cap)
    except Exception:
        pass
    return 100 * 1024 * 1024 if cap >= 128 * 1024 * 1024 else 40 * 1024 * 1024


_VMEM_LIMIT = _vmem_limit_bytes()


def _compiler_params():
    return pltpu.CompilerParams(
        dimension_semantics=("parallel",),
        vmem_limit_bytes=_VMEM_LIMIT,
    )


def _pad_cols(a, cp):
    c = a.shape[-1]
    if c == cp:
        return a
    return jnp.pad(a, [(0, 0)] * (a.ndim - 1) + [(0, cp - c)])


def _pad_rows(a, m_pad):
    m = a.shape[0]
    if m == m_pad:
        return a
    return jnp.pad(a, [(0, m_pad - m)] + [(0, 0)] * (a.ndim - 1))


def _pick_tile(m):
    """Balanced epilogue tiling: big tiles, >=2 grid steps when possible
    (v7x megacore), bounded row-padding waste."""
    n_tiles = max(1, _cdiv(m, _EPI_MAX_ROWS))
    if m >= 2 * _ROW_ALIGN:
        n_tiles = max(n_tiles, 2)
    tm = _round_up(_cdiv(m, n_tiles), _ROW_ALIGN)
    m_pad = _round_up(m, tm)
    return tm, m_pad


# ----------------------------------------------------------------------------
# Pallas kernels
# ----------------------------------------------------------------------------
def _conv_stats_kernel(x_ref, w_ref, y_ref, s_ref, *, tap_offsets):
    # One image: conv output = sum over taps of a shifted (mv, Cin)x(Cin, Cp)
    # bf16 MXU matmul, accumulated in f32.  Taps are Python-unrolled and read
    # shifted windows of the resident views via pl.ds (static offsets).
    mv, cp = y_ref.shape[1], y_ref.shape[2]
    acc = jnp.zeros((mv, cp), jnp.float32)
    for t, (view, off) in enumerate(tap_offsets):
        lhs = x_ref[view, 0, pl.ds(off, mv), :]            # (mv, Cin) bf16
        acc = acc + jnp.dot(lhs, w_ref[t], preferred_element_type=jnp.float32)
    # BN partials from the f32 accumulator, before the bf16 store of y.
    s_ref[0, 0:1, :] = jnp.sum(acc, axis=0, keepdims=True)
    s_ref[0, 1:2, :] = jnp.sum(acc * acc, axis=0, keepdims=True)
    y_ref[0] = acc.astype(y_ref.dtype)


def _affine_relu_kernel(y_ref, sc_ref, sh_ref, o_ref):
    # relu(y * scale + shift); bf16 in, f32 affine math, bf16 out.
    y = y_ref[...].astype(jnp.float32)
    o_ref[...] = jnp.maximum(y * sc_ref[...] + sh_ref[...], 0.0).astype(o_ref.dtype)


def _affine_add_relu_kernel(y_ref, r_ref, scy_ref, shy_ref, scr_ref, shr_ref,
                            o_ref):
    # relu(bn2(y) + bn_sc(residual)); both BN affines folded to scale/shift,
    # so the shortcut never takes its own normalization pass over HBM.
    y = y_ref[...].astype(jnp.float32)
    r = r_ref[...].astype(jnp.float32)
    out = y * scy_ref[...] + shy_ref[...] + r * scr_ref[...] + shr_ref[...]
    o_ref[...] = jnp.maximum(out, 0.0).astype(o_ref.dtype)


# ----------------------------------------------------------------------------
# Pallas call wrappers
# ----------------------------------------------------------------------------
def _conv_stats(views, w_taps, tap_offsets, mv, cp):
    """Per-image fused conv (sum of shifted matmuls) + BN partial statistics.

    views:  (P, N, Rm, Cin) bf16  -- W-shift/H-phase views of the padded input
    w_taps: (T, Cin, cp)    bf16  -- per-tap weights, lane-padded out channels
    Returns y (N, mv, cp) bf16 and stats (N, 2, cp) f32.
    """
    P, N, Rm, Cin = views.shape
    T = w_taps.shape[0]
    assert len(tap_offsets) == T
    kernel = functools.partial(_conv_stats_kernel, tap_offsets=tuple(tap_offsets))
    cost = pl.CostEstimate(
        flops=2 * N * mv * Cin * cp * T,
        transcendentals=0,
        bytes_accessed=(views.size * 2 + w_taps.size * 2
                        + N * mv * cp * 2 + N * 2 * cp * 4))
    return pl.pallas_call(
        kernel,
        out_shape=(jax.ShapeDtypeStruct((N, mv, cp), jnp.bfloat16),
                   jax.ShapeDtypeStruct((N, 2, cp), jnp.float32)),
        grid_spec=pltpu.PrefetchScalarGridSpec(
            num_scalar_prefetch=0,
            grid=(N,),
            in_specs=[
                pl.BlockSpec((P, 1, Rm, Cin), lambda n: (0, n, 0, 0)),
                pl.BlockSpec((T, Cin, cp), lambda n: (0, 0, 0)),   # resident
            ],
            out_specs=[
                pl.BlockSpec((1, mv, cp), lambda n: (n, 0, 0)),
                pl.BlockSpec((1, 2, cp), lambda n: (n, 0, 0)),
            ]),
        compiler_params=_compiler_params(),
        cost_estimate=cost,
    )(views, w_taps)


def _bn_relu(y, scale, shift, out_dtype):
    m, cp = y.shape
    tm, m_pad = _pick_tile(m)
    y = _pad_rows(y, m_pad)
    grid_m = m_pad // tm
    cost = pl.CostEstimate(
        flops=3 * m_pad * cp, transcendentals=0,
        bytes_accessed=m_pad * cp * (y.dtype.itemsize
                                     + jnp.dtype(out_dtype).itemsize) + 2 * cp * 4)
    out = pl.pallas_call(
        _affine_relu_kernel,
        out_shape=jax.ShapeDtypeStruct((m_pad, cp), out_dtype),
        grid_spec=pltpu.PrefetchScalarGridSpec(
            num_scalar_prefetch=0,
            grid=(grid_m,),
            in_specs=[
                pl.BlockSpec((tm, cp), lambda i: (i, 0)),
                pl.BlockSpec((1, cp), lambda i: (0, 0)),
                pl.BlockSpec((1, cp), lambda i: (0, 0)),
            ],
            out_specs=pl.BlockSpec((tm, cp), lambda i: (i, 0))),
        compiler_params=_compiler_params(),
        cost_estimate=cost,
    )(y, scale, shift)
    return out[:m]


def _bn_add_relu(y, res, sc_y, sh_y, sc_r, sh_r, out_dtype):
    m, cp = y.shape
    tm, m_pad = _pick_tile(m)
    y = _pad_rows(y, m_pad)
    res = _pad_rows(res, m_pad)
    grid_m = m_pad // tm
    cost = pl.CostEstimate(
        flops=6 * m_pad * cp, transcendentals=0,
        bytes_accessed=m_pad * cp * (y.dtype.itemsize + res.dtype.itemsize
                                     + jnp.dtype(out_dtype).itemsize) + 4 * cp * 4)
    out = pl.pallas_call(
        _affine_add_relu_kernel,
        out_shape=jax.ShapeDtypeStruct((m_pad, cp), out_dtype),
        grid_spec=pltpu.PrefetchScalarGridSpec(
            num_scalar_prefetch=0,
            grid=(grid_m,),
            in_specs=[
                pl.BlockSpec((tm, cp), lambda i: (i, 0)),
                pl.BlockSpec((tm, cp), lambda i: (i, 0)),
                pl.BlockSpec((1, cp), lambda i: (0, 0)),
                pl.BlockSpec((1, cp), lambda i: (0, 0)),
                pl.BlockSpec((1, cp), lambda i: (0, 0)),
                pl.BlockSpec((1, cp), lambda i: (0, 0)),
            ],
            out_specs=pl.BlockSpec((tm, cp), lambda i: (i, 0))),
        compiler_params=_compiler_params(),
        cost_estimate=cost,
    )(y, res, sc_y, sh_y, sc_r, sh_r)
    return out[:m]


# ----------------------------------------------------------------------------
# Plain-JAX glue
# ----------------------------------------------------------------------------
def _make_conv_views(xp, ksize, stride, Ho, Wo):
    """Decompose a spatially padded NHWC activation into ksize*stride views so
    every (i, j) tap of the ksize x ksize conv is a contiguous row window:

        view[(j, a)][n, r*Wo + c, :] == xp[n, a + stride*r, j + stride*c, :]
        tap (i, j) lhs rows          == view[(j, i%stride)][(i//stride)*Wo :][:Ho*Wo]
    """
    N, Hp, Wp, C = xp.shape
    R = Ho + _cdiv(ksize - 1, stride)
    views, view_idx = [], {}
    for j in range(ksize):
        for a in range(stride):
            v = xp[:, a::stride, j:j + stride * (Wo - 1) + 1:stride, :]
            v = v[:, :, :Wo, :]
            if v.shape[1] < R:                     # uniform row count; padded
                v = jnp.pad(v, ((0, 0), (0, R - v.shape[1]), (0, 0), (0, 0)))
            else:                                  # rows are never read by any tap
                v = v[:, :R]
            view_idx[(j, a)] = len(views)
            views.append(v.reshape(N, R * Wo, C))
    taps = tuple((view_idx[(j, i % stride)], (i // stride) * Wo)
                 for i in range(ksize) for j in range(ksize))
    return jnp.stack(views, axis=0), taps


def _fold_bn(stats, m_true, gamma, beta):
    """Per-image (sum, sumsq) partials -> global biased batch mean/var ->
    folded scale/shift (training-mode BatchNorm).
    NOTE: E[y^2]-E[y]^2 in f32 is cancellation-prone for |mean| >> std; clamped
    at 0 and validated against the f32 reference in __main__."""
    s1 = jnp.sum(stats[:, 0, :], axis=0)
    s2 = jnp.sum(stats[:, 1, :], axis=0)
    mu = s1 / m_true
    var = jnp.maximum(s2 / m_true - mu * mu, 0.0)
    inv = jax.lax.rsqrt(var + _EPS)
    scale = gamma.reshape(-1) * inv                # padded channels: gamma=0 -> 0
    shift = beta.reshape(-1) - mu * scale
    return scale[None, :], shift[None, :]


# ----------------------------------------------------------------------------
# Parameters (shapes mirror the PyTorch module; HWIO conv weights)
# ----------------------------------------------------------------------------
def init_basic_block_params(key, in_planes, planes, stride):
    k1, k2, k3 = jax.random.split(key, 3)
    params = {
        "w1": jax.random.normal(k1, (3, 3, in_planes, planes), jnp.float32) * 0.1,
        "g1": jnp.ones((1, planes), jnp.float32),
        "b1": jnp.zeros((1, planes), jnp.float32),
        "w2": jax.random.normal(k2, (3, 3, planes, planes), jnp.float32) * 0.1,
        "g2": jnp.ones((1, planes), jnp.float32),
        "b2": jnp.zeros((1, planes), jnp.float32),
    }
    if stride != 1 or in_planes != planes:
        params["w_sc"] = jax.random.normal(k3, (1, 1, in_planes, planes),
                                           jnp.float32) * 0.1
        params["g_sc"] = jnp.ones((1, planes), jnp.float32)
        params["b_sc"] = jnp.zeros((1, planes), jnp.float32)
    return params


# ----------------------------------------------------------------------------
# Forward pass (matches BasicBlock.forward, training-mode BatchNorm)
# ----------------------------------------------------------------------------
def basic_block_forward(x_nchw, params, *, stride):
    N, Cin, H, W = x_nchw.shape
    planes = params["w1"].shape[-1]
    cp = _round_up(max(planes, _LANE), _LANE)       # lane-dense output channels

    x = jnp.transpose(x_nchw, (0, 2, 3, 1)).astype(jnp.bfloat16)   # NHWC bf16

    Ho = (H + 2 - 3) // stride + 1
    Wo = (W + 2 - 3) // stride + 1
    mv = Ho * Wo
    M = N * mv

    # ---- conv1 (3x3, stride, pad=1) + bn1 + relu -------------------------
    xp = jnp.pad(x, ((0, 0), (1, 1), (1, 1), (0, 0)))
    views1, taps1 = _make_conv_views(xp, 3, stride, Ho, Wo)
    w1 = _pad_cols(params["w1"].reshape(9, Cin, planes), cp).astype(jnp.bfloat16)
    y1, st1 = _conv_stats(views1, w1, taps1, mv, cp)
    sc1, sh1 = _fold_bn(st1, M, _pad_cols(params["g1"], cp),
                        _pad_cols(params["b1"], cp))
    h1 = _bn_relu(y1.reshape(M, cp), sc1, sh1, jnp.bfloat16)       # (M, cp) bf16

    # ---- shortcut (bf16 residual; BN folded into the final epilogue) -----
    if "w_sc" in params:
        views_sc = x[:, ::stride, ::stride, :].reshape(1, N, mv, Cin)
        w_sc = _pad_cols(params["w_sc"].reshape(1, Cin, planes),
                         cp).astype(jnp.bfloat16)
        res, st_sc = _conv_stats(views_sc, w_sc, ((0, 0),), mv, cp)
        sc_r, sh_r = _fold_bn(st_sc, M, _pad_cols(params["g_sc"], cp),
                              _pad_cols(params["b_sc"], cp))
        res = res.reshape(M, cp)
    else:
        res = _pad_cols(x.reshape(M, Cin), cp)      # identity shortcut, bf16
        sc_r = jnp.ones((1, cp), jnp.float32)
        sh_r = jnp.zeros((1, cp), jnp.float32)

    # ---- conv2 (3x3, stride=1, pad=1) + bn2 + shortcut add + relu --------
    h1_nhwc = h1[:, :planes].reshape(N, Ho, Wo, planes)
    hp = jnp.pad(h1_nhwc, ((0, 0), (1, 1), (1, 1), (0, 0)))
    views2, taps2 = _make_conv_views(hp, 3, 1, Ho, Wo)
    w2 = _pad_cols(params["w2"].reshape(9, planes, planes), cp).astype(jnp.bfloat16)
    y2, st2 = _conv_stats(views2, w2, taps2, mv, cp)
    sc2, sh2 = _fold_bn(st2, M, _pad_cols(params["g2"], cp),
                        _pad_cols(params["b2"], cp))
    out = _bn_add_relu(y2.reshape(M, cp), res, sc2, sh2, sc_r, sh_r,
                       jnp.bfloat16)                               # (M, cp) bf16

    out = out[:, :planes].reshape(N, Ho, Wo, planes)
    return jnp.transpose(out, (0, 3, 1, 2)).astype(jnp.float32)    # NCHW f32


# ----------------------------------------------------------------------------
# Pure-JAX f32 reference (training-mode BatchNorm) for validation
# ----------------------------------------------------------------------------
def _reference_forward(x_nchw, params, *, stride):
    x = jnp.transpose(x_nchw, (0, 2, 3, 1)).astype(jnp.float32)

    def conv(h, w, s, pad):
        return jax.lax.conv_general_dilated(
            h, w.astype(jnp.float32), window_strides=(s, s),
            padding=((pad, pad), (pad, pad)),
            dimension_numbers=("NHWC", "HWIO", "NHWC"))

    def bn(h, g, b):
        mu = jnp.mean(h, axis=(0, 1, 2))
        var = jnp.mean(jnp.square(h - mu), axis=(0, 1, 2))
        return (h - mu) * jax.lax.rsqrt(var + _EPS) * g.reshape(-1) + b.reshape(-1)

    h = jax.nn.relu(bn(conv(x, params["w1"], stride, 1), params["g1"], params["b1"]))
    h = bn(conv(h, params["w2"], 1, 1), params["g2"], params["b2"])
    if "w_sc" in params:
        r = bn(conv(x, params["w_sc"], stride, 0), params["g_sc"], params["b_sc"])
    else:
        r = x
    return jnp.transpose(jax.nn.relu(h + r), (0, 3, 1, 2))


if __name__ == "__main__":
    key = jax.random.PRNGKey(0)
    kx, kp, kx2, kp2 = jax.random.split(key, 4)

    # Config A: stride-2 block with projection (conv1x1 + BN) shortcut.
    N, in_planes, planes, H, W, stride = 2, 4, 8, 16, 16, 2
    x = jax.random.normal(kx, (N, in_planes, H, W), jnp.float32)
    params = init_basic_block_params(kp, in_planes, planes, stride)
    fwd = jax.jit(functools.partial(basic_block_forward, stride=stride))
    out = fwd(x, params)
    jax.block_until_ready(out)
    assert out.shape == (N, planes, H // stride, W // stride), out.shape
    assert bool(jnp.all(out >= 0.0)), "final ReLU violated"
    ref = _reference_forward(x, params, stride=stride)
    err = float(jnp.max(jnp.abs(out - ref)))
    assert err < 0.1, f"config A mismatch vs f32 reference: max abs err {err}"

    # Config B: identity shortcut (stride=1, in_planes == planes).
    x2 = jax.random.normal(kx2, (2, 8, 8, 8), jnp.float32)
    params2 = init_basic_block_params(kp2, 8, 8, 1)
    fwd2 = jax.jit(functools.partial(basic_block_forward, stride=1))
    out2 = fwd2(x2, params2)
    jax.block_until_ready(out2)
    assert out2.shape == (2, 8, 8, 8), out2.shape
    assert bool(jnp.all(out2 >= 0.0)), "final ReLU violated"
    ref2 = _reference_forward(x2, params2, stride=1)
    err2 = float(jnp.max(jnp.abs(out2 - ref2)))
    assert err2 < 0.1, f"config B mismatch vs f32 reference: max abs err {err2}"

    print("KERNEL_OK")
</pallas_src>

<mosaic_0001>
module attributes {stable_mosaic.version = 11 : i64} {
  func.func @_conv_stats_kernel(%arg0: i32, %arg1: memref<6x1x72x4xbf16, #tpu.memory_space<vmem>>, %arg2: memref<9x4x128xbf16, #tpu.memory_space<vmem>>, %arg3: memref<1x64x128xbf16, #tpu.memory_space<vmem>>, %arg4: memref<1x2x128xf32, #tpu.memory_space<vmem>>) attributes {dimension_semantics = [#tpu.dimension_semantics<parallel>], iteration_bounds = array<i64: 2>, scalar_prefetch = 0 : i64, scratch_operands = 0 : i64, tpu.core_type = #tpu.core_type<tc>, window_params = [{transform_indices = @transform_0, window_bounds = array<i64: 6, 1, 72, 4>}, {pipeline_mode = #tpu.pipeline_mode<synchronous>, transform_indices = @transform_1, window_bounds = array<i64: 9, 4, 128>}, {transform_indices = @transform_2, window_bounds = array<i64: 1, 64, 128>}, {transform_indices = @transform_3, window_bounds = array<i64: 1, 2, 128>}]} {
    %cst = arith.constant 0.000000e+00 : f32
    %0 = vector.broadcast %cst : f32 to vector<64x128xf32>
    %c0 = arith.constant 0 : index
    %c0_0 = arith.constant 0 : index
    %c0_1 = arith.constant 0 : index
    %c0_2 = arith.constant 0 : index
    %1 = vector.load %arg1[%c0, %c0_0, %c0_1, %c0_2] : memref<6x1x72x4xbf16, #tpu.memory_space<vmem>>, vector<1x1x64x4xbf16>
    %2 = vector.shape_cast %1 : vector<1x1x64x4xbf16> to vector<64x4xbf16>
    %c0_3 = arith.constant 0 : index
    %c0_4 = arith.constant 0 : index
    %c0_5 = arith.constant 0 : index
    %3 = vector.load %arg2[%c0_3, %c0_4, %c0_5] : memref<9x4x128xbf16, #tpu.memory_space<vmem>>, vector<1x4x128xbf16>
    %4 = vector.shape_cast %3 : vector<1x4x128xbf16> to vector<4x128xbf16>
    %cst_6 = arith.constant dense<0.000000e+00> : vector<64x128xf32>
    %5 = tpu.matmul %2, %4, %cst_6 {dimension_numbers = #tpu.dot_dimension_numbers<[1], [0], [0], [1], [0, 0, 1, 1], [], []>} : vector<64x4xbf16>, vector<4x128xbf16>, vector<64x128xf32> -> vector<64x128xf32>
    %6 = arith.addf %0, %5 : vector<64x128xf32>
    %c2 = arith.constant 2 : index
    %c0_7 = arith.constant 0 : index
    %c0_8 = arith.constant 0 : index
    %c0_9 = arith.constant 0 : index
    %7 = vector.load %arg1[%c2, %c0_7, %c0_8, %c0_9] : memref<6x1x72x4xbf16, #tpu.memory_space<vmem>>, vector<1x1x64x4xbf16>
    %8 = vector.shape_cast %7 : vector<1x1x64x4xbf16> to vector<64x4xbf16>
    %c1 = arith.constant 1 : index
    %c0_10 = arith.constant 0 : index
    %c0_11 = arith.constant 0 : index
    %9 = vector.load %arg2[%c1, %c0_10, %c0_11] : memref<9x4x128xbf16, #tpu.memory_space<vmem>>, vector<1x4x128xbf16>
    %10 = vector.shape_cast %9 : vector<1x4x128xbf16> to vector<4x128xbf16>
    %cst_12 = arith.constant dense<0.000000e+00> : vector<64x128xf32>
    %11 = tpu.matmul %8, %10, %cst_12 {dimension_numbers = #tpu.dot_dimension_numbers<[1], [0], [0], [1], [0, 0, 1, 1], [], []>} : vector<64x4xbf16>, vector<4x128xbf16>, vector<64x128xf32> -> vector<64x128xf32>
    %12 = arith.addf %6, %11 : vector<64x128xf32>
    %c4 = arith.constant 4 : index
    %c0_13 = arith.constant 0 : index
    %c0_14 = arith.constant 0 : index
    %c0_15 = arith.constant 0 : index
    %13 = vector.load %arg1[%c4, %c0_13, %c0_14, %c0_15] : memref<6x1x72x4xbf16, #tpu.memory_space<vmem>>, vector<1x1x64x4xbf16>
    %14 = vector.shape_cast %13 : vector<1x1x64x4xbf16> to vector<64x4xbf16>
    %c2_16 = arith.constant 2 : index
    %c0_17 = arith.constant 0 : index
    %c0_18 = arith.constant 0 : index
    %15 = vector.load %arg2[%c2_16, %c0_17, %c0_18] : memref<9x4x128xbf16, #tpu.memory_space<vmem>>, vector<1x4x128xbf16>
    %16 = vector.shape_cast %15 : vector<1x4x128xbf16> to vector<4x128xbf16>
    %cst_19 = arith.constant dense<0.000000e+00> : vector<64x128xf32>
    %17 = tpu.matmul %14, %16, %cst_19 {dimension_numbers = #tpu.dot_dimension_numbers<[1], [0], [0], [1], [0, 0, 1, 1], [], []>} : vector<64x4xbf16>, vector<4x128xbf16>, vector<64x128xf32> -> vector<64x128xf32>
    %18 = arith.addf %12, %17 : vector<64x128xf32>
    %c1_20 = arith.constant 1 : index
    %c0_21 = arith.constant 0 : index
    %c0_22 = arith.constant 0 : index
    %c0_23 = arith.constant 0 : index
    %19 = vector.load %arg1[%c1_20, %c0_21, %c0_22, %c0_23] : memref<6x1x72x4xbf16, #tpu.memory_space<vmem>>, vector<1x1x64x4xbf16>
    %20 = vector.shape_cast %19 : vector<1x1x64x4xbf16> to vector<64x4xbf16>
    %c3 = arith.constant 3 : index
    %c0_24 = arith.constant 0 : index
    %c0_25 = arith.constant 0 : index
    %21 = vector.load %arg2[%c3, %c0_24, %c0_25] : memref<9x4x128xbf16, #tpu.memory_space<vmem>>, vector<1x4x128xbf16>
    %22 = vector.shape_cast %21 : vector<1x4x128xbf16> to vector<4x128xbf16>
    %cst_26 = arith.constant dense<0.000000e+00> : vector<64x128xf32>
    %23 = tpu.matmul %20, %22, %cst_26 {dimension_numbers = #tpu.dot_dimension_numbers<[1], [0], [0], [1], [0, 0, 1, 1], [], []>} : vector<64x4xbf16>, vector<4x128xbf16>, vector<64x128xf32> -> vector<64x128xf32>
    %24 = arith.addf %18, %23 : vector<64x128xf32>
    %c3_27 = arith.constant 3 : index
    %c0_28 = arith.constant 0 : index
    %c0_29 = arith.constant 0 : index
    %c0_30 = arith.constant 0 : index
    %25 = vector.load %arg1[%c3_27, %c0_28, %c0_29, %c0_30] : memref<6x1x72x4xbf16, #tpu.memory_space<vmem>>, vector<1x1x64x4xbf16>
    %26 = vector.shape_cast %25 : vector<1x1x64x4xbf16> to vector<64x4xbf16>
    %c4_31 = arith.constant 4 : index
    %c0_32 = arith.constant 0 : index
    %c0_33 = arith.constant 0 : index
    %27 = vector.load %arg2[%c4_31, %c0_32, %c0_33] : memref<9x4x128xbf16, #tpu.memory_space<vmem>>, vector<1x4x128xbf16>
    %28 = vector.shape_cast %27 : vector<1x4x128xbf16> to vector<4x128xbf16>
    %cst_34 = arith.constant dense<0.000000e+00> : vector<64x128xf32>
    %29 = tpu.matmul %26, %28, %cst_34 {dimension_numbers = #tpu.dot_dimension_numbers<[1], [0], [0], [1], [0, 0, 1, 1], [], []>} : vector<64x4xbf16>, vector<4x128xbf16>, vector<64x128xf32> -> vector<64x128xf32>
    %30 = arith.addf %24, %29 : vector<64x128xf32>
    %c5 = arith.constant 5 : index
    %c0_35 = arith.constant 0 : index
    %c0_36 = arith.constant 0 : index
    %c0_37 = arith.constant 0 : index
    %31 = vector.load %arg1[%c5, %c0_35, %c0_36, %c0_37] : memref<6x1x72x4xbf16, #tpu.memory_space<vmem>>, vector<1x1x64x4xbf16>
    %32 = vector.shape_cast %31 : vector<1x1x64x4xbf16> to vector<64x4xbf16>
    %c5_38 = arith.constant 5 : index
    %c0_39 = arith.constant 0 : index
    %c0_40 = arith.constant 0 : index
    %33 = vector.load %arg2[%c5_38, %c0_39, %c0_40] : memref<9x4x128xbf16, #tpu.memory_space<vmem>>, vector<1x4x128xbf16>
    %34 = vector.shape_cast %33 : vector<1x4x128xbf16> to vector<4x128xbf16>
    %cst_41 = arith.constant dense<0.000000e+00> : vector<64x128xf32>
    %35 = tpu.matmul %32, %34, %cst_41 {dimension_numbers = #tpu.dot_dimension_numbers<[1], [0], [0], [1], [0, 0, 1, 1], [], []>} : vector<64x4xbf16>, vector<4x128xbf16>, vector<64x128xf32> -> vector<64x128xf32>
    %36 = arith.addf %30, %35 : vector<64x128xf32>
    %c0_42 = arith.constant 0 : index
    %c0_43 = arith.constant 0 : index
    %c8 = arith.constant 8 : index
    %c0_44 = arith.constant 0 : index
    %37 = vector.load %arg1[%c0_42, %c0_43, %c8, %c0_44] : memref<6x1x72x4xbf16, #tpu.memory_space<vmem>>, vector<1x1x64x4xbf16>
    %38 = vector.shape_cast %37 : vector<1x1x64x4xbf16> to vector<64x4xbf16>
    %c6 = arith.constant 6 : index
    %c0_45 = arith.constant 0 : index
    %c0_46 = arith.constant 0 : index
    %39 = vector.load %arg2[%c6, %c0_45, %c0_46] : memref<9x4x128xbf16, #tpu.memory_space<vmem>>, vector<1x4x128xbf16>
    %40 = vector.shape_cast %39 : vector<1x4x128xbf16> to vector<4x128xbf16>
    %cst_47 = arith.constant dense<0.000000e+00> : vector<64x128xf32>
    %41 = tpu.matmul %38, %40, %cst_47 {dimension_numbers = #tpu.dot_dimension_numbers<[1], [0], [0], [1], [0, 0, 1, 1], [], []>} : vector<64x4xbf16>, vector<4x128xbf16>, vector<64x128xf32> -> vector<64x128xf32>
    %42 = arith.addf %36, %41 : vector<64x128xf32>
    %c2_48 = arith.constant 2 : index
    %c0_49 = arith.constant 0 : index
    %c8_50 = arith.constant 8 : index
    %c0_51 = arith.constant 0 : index
    %43 = vector.load %arg1[%c2_48, %c0_49, %c8_50, %c0_51] : memref<6x1x72x4xbf16, #tpu.memory_space<vmem>>, vector<1x1x64x4xbf16>
    %44 = vector.shape_cast %43 : vector<1x1x64x4xbf16> to vector<64x4xbf16>
    %c7 = arith.constant 7 : index
    %c0_52 = arith.constant 0 : index
    %c0_53 = arith.constant 0 : index
    %45 = vector.load %arg2[%c7, %c0_52, %c0_53] : memref<9x4x128xbf16, #tpu.memory_space<vmem>>, vector<1x4x128xbf16>
    %46 = vector.shape_cast %45 : vector<1x4x128xbf16> to vector<4x128xbf16>
    %cst_54 = arith.constant dense<0.000000e+00> : vector<64x128xf32>
    %47 = tpu.matmul %44, %46, %cst_54 {dimension_numbers = #tpu.dot_dimension_numbers<[1], [0], [0], [1], [0, 0, 1, 1], [], []>} : vector<64x4xbf16>, vector<4x128xbf16>, vector<64x128xf32> -> vector<64x128xf32>
    %48 = arith.addf %42, %47 : vector<64x128xf32>
    %c4_55 = arith.constant 4 : index
    %c0_56 = arith.constant 0 : index
    %c8_57 = arith.constant 8 : index
    %c0_58 = arith.constant 0 : index
    %49 = vector.load %arg1[%c4_55, %c0_56, %c8_57, %c0_58] : memref<6x1x72x4xbf16, #tpu.memory_space<vmem>>, vector<1x1x64x4xbf16>
    %50 = vector.shape_cast %49 : vector<1x1x64x4xbf16> to vector<64x4xbf16>
    %c8_59 = arith.constant 8 : index
    %c0_60 = arith.constant 0 : index
    %c0_61 = arith.constant 0 : index
    %51 = vector.load %arg2[%c8_59, %c0_60, %c0_61] : memref<9x4x128xbf16, #tpu.memory_space<vmem>>, vector<1x4x128xbf16>
    %52 = vector.shape_cast %51 : vector<1x4x128xbf16> to vector<4x128xbf16>
    %cst_62 = arith.constant dense<0.000000e+00> : vector<64x128xf32>
    %53 = tpu.matmul %50, %52, %cst_62 {dimension_numbers = #tpu.dot_dimension_numbers<[1], [0], [0], [1], [0, 0, 1, 1], [], []>} : vector<64x4xbf16>, vector<4x128xbf16>, vector<64x128xf32> -> vector<64x128xf32>
    %54 = arith.addf %48, %53 : vector<64x128xf32>
    %cst_63 = arith.constant dense<0.000000e+00> : vector<128xf32>
    %55 = vector.multi_reduction <add>, %54, %cst_63 [0] : vector<64x128xf32> to vector<128xf32>
    %56 = vector.shape_cast %55 : vector<128xf32> to vector<1x128xf32>
    %c0_64 = arith.constant 0 : index
    %c0_65 = arith.constant 0 : index
    %c0_66 = arith.constant 0 : index
    %57 = vector.load %arg4[%c0_64, %c0_65, %c0_66] : memref<1x2x128xf32, #tpu.memory_space<vmem>>, vector<1x1x128xf32>
    %58 = vector.shape_cast %57 : vector<1x1x128xf32> to vector<1x128xf32>
    %59 = vector.shape_cast %56 : vector<1x128xf32> to vector<1x1x128xf32>
    tpu.vector_store %arg4[%c0_64, %c0_65, %c0_66], %59 {strides = array<i32>} : memref<1x2x128xf32, #tpu.memory_space<vmem>>, vector<1x1x128xf32>,
    %60 = arith.mulf %54, %54 : vector<64x128xf32>
    %cst_67 = arith.constant dense<0.000000e+00> : vector<128xf32>
    %61 = vector.multi_reduction <add>, %60, %cst_67 [0] : vector<64x128xf32> to vector<128xf32>
    %62 = vector.shape_cast %61 : vector<128xf32> to vector<1x128xf32>
    %c0_68 = arith.constant 0 : index
    %c1_69 = arith.constant 1 : index
    %c0_70 = arith.constant 0 : index
    %63 = vector.load %arg4[%c0_68, %c1_69, %c0_70] : memref<1x2x128xf32, #tpu.memory_space<vmem>>, vector<1x1x128xf32>
    %64 = vector.shape_cast %63 : vector<1x1x128xf32> to vector<1x128xf32>
    %65 = vector.shape_cast %62 : vector<1x128xf32> to vector<1x1x128xf32>
    tpu.vector_store %arg4[%c0_68, %c1_69, %c0_70], %65 {strides = array<i32>} : memref<1x2x128xf32, #tpu.memory_space<vmem>>, vector<1x1x128xf32>,
    %66 = arith.truncf %54 : vector<64x128xf32> to vector<64x128xbf16>
    %c0_71 = arith.constant 0 : index
    %c0_72 = arith.constant 0 : index
    %c0_73 = arith.constant 0 : index
    %67 = vector.load %arg3[%c0_71, %c0_72, %c0_73] : memref<1x64x128xbf16, #tpu.memory_space<vmem>>, vector<1x64x128xbf16>
    %68 = vector.shape_cast %67 : vector<1x64x128xbf16> to vector<64x128xbf16>
    %69 = vector.shape_cast %66 : vector<64x128xbf16> to vector<1x64x128xbf16>
    tpu.vector_store %arg3[%c0_71, %c0_72, %c0_73], %69 {strides = array<i32>} : memref<1x64x128xbf16, #tpu.memory_space<vmem>>, vector<1x64x128xbf16>,
    return
  }
  func.func @transform_0(%arg0: i32) -> (i32, i32, i32, i32) {
    %c0_i32 = arith.constant 0 : i32
    %c0_i32_0 = arith.constant 0 : i32
    %c0_i32_1 = arith.constant 0 : i32
    %c0_i32_2 = arith.constant 0 : i32
    return %c0_i32, %arg0, %c0_i32_0, %c0_i32_1 : i32, i32, i32, i32
  }
  func.func @transform_1(%arg0: i32) -> (i32, i32, i32) {
    %c0_i32 = arith.constant 0 : i32
    %c0_i32_0 = arith.constant 0 : i32
    %c0_i32_1 = arith.constant 0 : i32
    %c0_i32_2 = arith.constant 0 : i32
    return %c0_i32, %c0_i32_0, %c0_i32_1 : i32, i32, i32
  }
  func.func @transform_2(%arg0: i32) -> (i32, i32, i32) {
    %c0_i32 = arith.constant 0 : i32
    %c0_i32_0 = arith.constant 0 : i32
    %c0_i32_1 = arith.constant 0 : i32
    return %arg0, %c0_i32, %c0_i32_0 : i32, i32, i32
  }
  func.func @transform_3(%arg0: i32) -> (i32, i32, i32) {
    %c0_i32 = arith.constant 0 : i32
    %c0_i32_0 = arith.constant 0 : i32
    %c0_i32_1 = arith.constant 0 : i32
    return %arg0, %c0_i32, %c0_i32_0 : i32, i32, i32
  }
}

module attributes {stable_mosaic.version = 11 : i64} {
  func.func @_affine_relu_kernel(%arg0: i32, %arg1: memref<64x128xbf16, #tpu.memory_space<vmem>>, %arg2: memref<1x128xf32, #tpu.memory_space<vmem>>, %arg3: memref<1x128xf32, #tpu.memory_space<vmem>>, %arg4: memref<64x128xbf16, #tpu.memory_space<vmem>>) attributes {dimension_semantics = [#tpu.dimension_semantics<parallel>], iteration_bounds = array<i64: 2>, scalar_prefetch = 0 : i64, scratch_operands = 0 : i64, tpu.core_type = #tpu.core_type<tc>, window_params = [{transform_indices = @transform_0, window_bounds = array<i64: 64, 128>}, {pipeline_mode = #tpu.pipeline_mode<synchronous>, transform_indices = @transform_1, window_bounds = array<i64: 1, 128>}, {pipeline_mode = #tpu.pipeline_mode<synchronous>, transform_indices = @transform_2, window_bounds = array<i64: 1, 128>}, {transform_indices = @transform_3, window_bounds = array<i64: 64, 128>}]} {
    %c0 = arith.constant 0 : index
    %c0_0 = arith.constant 0 : index
    %0 = vector.load %arg1[%c0, %c0_0] : memref<64x128xbf16, #tpu.memory_space<vmem>>, vector<64x128xbf16>
    %1 = arith.extf %0 : vector<64x128xbf16> to vector<64x128xf32>
    %c0_1 = arith.constant 0 : index
    %c0_2 = arith.constant 0 : index
    %2 = vector.load %arg2[%c0_1, %c0_2] : memref<1x128xf32, #tpu.memory_space<vmem>>, vector<1x128xf32>
    %3 = vector.broadcast %2 : vector<1x128xf32> to vector<64x128xf32>
    %4 = arith.mulf %1, %3 : vector<64x128xf32>
    %c0_3 = arith.constant 0 : index
    %c0_4 = arith.constant 0 : index
    %5 = vector.load %arg3[%c0_3, %c0_4] : memref<1x128xf32, #tpu.memory_space<vmem>>, vector<1x128xf32>
    %6 = vector.broadcast %5 : vector<1x128xf32> to vector<64x128xf32>
    %7 = arith.addf %4, %6 : vector<64x128xf32>
    %cst = arith.constant 0.000000e+00 : f32
    %8 = vector.broadcast %cst : f32 to vector<64x128xf32>
    %9 = arith.maximumf %7, %8 : vector<64x128xf32>
    %10 = arith.truncf %9 : vector<64x128xf32> to vector<64x128xbf16>
    %c0_5 = arith.constant 0 : index
    %c0_6 = arith.constant 0 : index
    %11 = vector.load %arg4[%c0_5, %c0_6] : memref<64x128xbf16, #tpu.memory_space<vmem>>, vector<64x128xbf16>
    tpu.vector_store %arg4[%c0_5, %c0_6], %10 {strides = array<i32>} : memref<64x128xbf16, #tpu.memory_space<vmem>>, vector<64x128xbf16>,
    return
  }
  func.func @transform_0(%arg0: i32) -> (i32, i32) {
    %c0_i32 = arith.constant 0 : i32
    %c0_i32_0 = arith.constant 0 : i32
    return %arg0, %c0_i32 : i32, i32
  }
  func.func @transform_1(%arg0: i32) -> (i32, i32) {
    %c0_i32 = arith.constant 0 : i32
    %c0_i32_0 = arith.constant 0 : i32
    %c0_i32_1 = arith.constant 0 : i32
    return %c0_i32, %c0_i32_0 : i32, i32
  }
  func.func @transform_2(%arg0: i32) -> (i32, i32) {
    %c0_i32 = arith.constant 0 : i32
    %c0_i32_0 = arith.constant 0 : i32
    %c0_i32_1 = arith.constant 0 : i32
    return %c0_i32, %c0_i32_0 : i32, i32
  }
  func.func @transform_3(%arg0: i32) -> (i32, i32) {
    %c0_i32 = arith.constant 0 : i32
    %c0_i32_0 = arith.constant 0 : i32
    return %arg0, %c0_i32 : i32, i32
  }
}

module attributes {stable_mosaic.version = 11 : i64} {
  func.func @_conv_stats_kernel(%arg0: i32, %arg1: memref<3x1x80x8xbf16, #tpu.memory_space<vmem>>, %arg2: memref<9x8x128xbf16, #tpu.memory_space<vmem>>, %arg3: memref<1x64x128xbf16, #tpu.memory_space<vmem>>, %arg4: memref<1x2x128xf32, #tpu.memory_space<vmem>>) attributes {dimension_semantics = [#tpu.dimension_semantics<parallel>], iteration_bounds = array<i64: 2>, scalar_prefetch = 0 : i64, scratch_operands = 0 : i64, tpu.core_type = #tpu.core_type<tc>, window_params = [{transform_indices = @transform_0, window_bounds = array<i64: 3, 1, 80, 8>}, {pipeline_mode = #tpu.pipeline_mode<synchronous>, transform_indices = @transform_1, window_bounds = array<i64: 9, 8, 128>}, {transform_indices = @transform_2, window_bounds = array<i64: 1, 64, 128>}, {transform_indices = @transform_3, window_bounds = array<i64: 1, 2, 128>}]} {
    %cst = arith.constant 0.000000e+00 : f32
    %0 = vector.broadcast %cst : f32 to vector<64x128xf32>
    %c0 = arith.constant 0 : index
    %c0_0 = arith.constant 0 : index
    %c0_1 = arith.constant 0 : index
    %c0_2 = arith.constant 0 : index
    %1 = vector.load %arg1[%c0, %c0_0, %c0_1, %c0_2] : memref<3x1x80x8xbf16, #tpu.memory_space<vmem>>, vector<1x1x64x8xbf16>
    %2 = vector.shape_cast %1 : vector<1x1x64x8xbf16> to vector<64x8xbf16>
    %c0_3 = arith.constant 0 : index
    %c0_4 = arith.constant 0 : index
    %c0_5 = arith.constant 0 : index
    %3 = vector.load %arg2[%c0_3, %c0_4, %c0_5] : memref<9x8x128xbf16, #tpu.memory_space<vmem>>, vector<1x8x128xbf16>
    %4 = vector.shape_cast %3 : vector<1x8x128xbf16> to vector<8x128xbf16>
    %cst_6 = arith.constant dense<0.000000e+00> : vector<64x128xf32>
    %5 = tpu.matmul %2, %4, %cst_6 {dimension_numbers = #tpu.dot_dimension_numbers<[1], [0], [0], [1], [0, 0, 1, 1], [], []>} : vector<64x8xbf16>, vector<8x128xbf16>, vector<64x128xf32> -> vector<64x128xf32>
    %6 = arith.addf %0, %5 : vector<64x128xf32>
    %c1 = arith.constant 1 : index
    %c0_7 = arith.constant 0 : index
    %c0_8 = arith.constant 0 : index
    %c0_9 = arith.constant 0 : index
    %7 = vector.load %arg1[%c1, %c0_7, %c0_8, %c0_9] : memref<3x1x80x8xbf16, #tpu.memory_space<vmem>>, vector<1x1x64x8xbf16>
    %8 = vector.shape_cast %7 : vector<1x1x64x8xbf16> to vector<64x8xbf16>
    %c1_10 = arith.constant 1 : index
    %c0_11 = arith.constant 0 : index
    %c0_12 = arith.constant 0 : index
    %9 = vector.load %arg2[%c1_10, %c0_11, %c0_12] : memref<9x8x128xbf16, #tpu.memory_space<vmem>>, vector<1x8x128xbf16>
    %10 = vector.shape_cast %9 : vector<1x8x128xbf16> to vector<8x128xbf16>
    %cst_13 = arith.constant dense<0.000000e+00> : vector<64x128xf32>
    %11 = tpu.matmul %8, %10, %cst_13 {dimension_numbers = #tpu.dot_dimension_numbers<[1], [0], [0], [1], [0, 0, 1, 1], [], []>} : vector<64x8xbf16>, vector<8x128xbf16>, vector<64x128xf32> -> vector<64x128xf32>
    %12 = arith.addf %6, %11 : vector<64x128xf32>
    %c2 = arith.constant 2 : index
    %c0_14 = arith.constant 0 : index
    %c0_15 = arith.constant 0 : index
    %c0_16 = arith.constant 0 : index
    %13 = vector.load %arg1[%c2, %c0_14, %c0_15, %c0_16] : memref<3x1x80x8xbf16, #tpu.memory_space<vmem>>, vector<1x1x64x8xbf16>
    %14 = vector.shape_cast %13 : vector<1x1x64x8xbf16> to vector<64x8xbf16>
    %c2_17 = arith.constant 2 : index
    %c0_18 = arith.constant 0 : index
    %c0_19 = arith.constant 0 : index
    %15 = vector.load %arg2[%c2_17, %c0_18, %c0_19] : memref<9x8x128xbf16, #tpu.memory_space<vmem>>, vector<1x8x128xbf16>
    %16 = vector.shape_cast %15 : vector<1x8x128xbf16> to vector<8x128xbf16>
    %cst_20 = arith.constant dense<0.000000e+00> : vector<64x128xf32>
    %17 = tpu.matmul %14, %16, %cst_20 {dimension_numbers = #tpu.dot_dimension_numbers<[1], [0], [0], [1], [0, 0, 1, 1], [], []>} : vector<64x8xbf16>, vector<8x128xbf16>, vector<64x128xf32> -> vector<64x128xf32>
    %18 = arith.addf %12, %17 : vector<64x128xf32>
    %c0_21 = arith.constant 0 : index
    %c0_22 = arith.constant 0 : index
    %c8 = arith.constant 8 : index
    %c0_23 = arith.constant 0 : index
    %19 = vector.load %arg1[%c0_21, %c0_22, %c8, %c0_23] : memref<3x1x80x8xbf16, #tpu.memory_space<vmem>>, vector<1x1x64x8xbf16>
    %20 = vector.shape_cast %19 : vector<1x1x64x8xbf16> to vector<64x8xbf16>
    %c3 = arith.constant 3 : index
    %c0_24 = arith.constant 0 : index
    %c0_25 = arith.constant 0 : index
    %21 = vector.load %arg2[%c3, %c0_24, %c0_25] : memref<9x8x128xbf16, #tpu.memory_space<vmem>>, vector<1x8x128xbf16>
    %22 = vector.shape_cast %21 : vector<1x8x128xbf16> to vector<8x128xbf16>
    %cst_26 = arith.constant dense<0.000000e+00> : vector<64x128xf32>
    %23 = tpu.matmul %20, %22, %cst_26 {dimension_numbers = #tpu.dot_dimension_numbers<[1], [0], [0], [1], [0, 0, 1, 1], [], []>} : vector<64x8xbf16>, vector<8x128xbf16>, vector<64x128xf32> -> vector<64x128xf32>
    %24 = arith.addf %18, %23 : vector<64x128xf32>
    %c1_27 = arith.constant 1 : index
    %c0_28 = arith.constant 0 : index
    %c8_29 = arith.constant 8 : index
    %c0_30 = arith.constant 0 : index
    %25 = vector.load %arg1[%c1_27, %c0_28, %c8_29, %c0_30] : memref<3x1x80x8xbf16, #tpu.memory_space<vmem>>, vector<1x1x64x8xbf16>
    %26 = vector.shape_cast %25 : vector<1x1x64x8xbf16> to vector<64x8xbf16>
    %c4 = arith.constant 4 : index
    %c0_31 = arith.constant 0 : index
    %c0_32 = arith.constant 0 : index
    %27 = vector.load %arg2[%c4, %c0_31, %c0_32] : memref<9x8x128xbf16, #tpu.memory_space<vmem>>, vector<1x8x128xbf16>
    %28 = vector.shape_cast %27 : vector<1x8x128xbf16> to vector<8x128xbf16>
    %cst_33 = arith.constant dense<0.000000e+00> : vector<64x128xf32>
    %29 = tpu.matmul %26, %28, %cst_33 {dimension_numbers = #tpu.dot_dimension_numbers<[1], [0], [0], [1], [0, 0, 1, 1], [], []>} : vector<64x8xbf16>, vector<8x128xbf16>, vector<64x128xf32> -> vector<64x128xf32>
    %30 = arith.addf %24, %29 : vector<64x128xf32>
    %c2_34 = arith.constant 2 : index
    %c0_35 = arith.constant 0 : index
    %c8_36 = arith.constant 8 : index
    %c0_37 = arith.constant 0 : index
    %31 = vector.load %arg1[%c2_34, %c0_35, %c8_36, %c0_37] : memref<3x1x80x8xbf16, #tpu.memory_space<vmem>>, vector<1x1x64x8xbf16>
    %32 = vector.shape_cast %31 : vector<1x1x64x8xbf16> to vector<64x8xbf16>
    %c5 = arith.constant 5 : index
    %c0_38 = arith.constant 0 : index
    %c0_39 = arith.constant 0 : index
    %33 = vector.load %arg2[%c5, %c0_38, %c0_39] : memref<9x8x128xbf16, #tpu.memory_space<vmem>>, vector<1x8x128xbf16>
    %34 = vector.shape_cast %33 : vector<1x8x128xbf16> to vector<8x128xbf16>
    %cst_40 = arith.constant dense<0.000000e+00> : vector<64x128xf32>
    %35 = tpu.matmul %32, %34, %cst_40 {dimension_numbers = #tpu.dot_dimension_numbers<[1], [0], [0], [1], [0, 0, 1, 1], [], []>} : vector<64x8xbf16>, vector<8x128xbf16>, vector<64x128xf32> -> vector<64x128xf32>
    %36 = arith.addf %30, %35 : vector<64x128xf32>
    %c0_41 = arith.constant 0 : index
    %c0_42 = arith.constant 0 : index
    %c16 = arith.constant 16 : index
    %c0_43 = arith.constant 0 : index
    %37 = vector.load %arg1[%c0_41, %c0_42, %c16, %c0_43] : memref<3x1x80x8xbf16, #tpu.memory_space<vmem>>, vector<1x1x64x8xbf16>
    %38 = vector.shape_cast %37 : vector<1x1x64x8xbf16> to vector<64x8xbf16>
    %c6 = arith.constant 6 : index
    %c0_44 = arith.constant 0 : index
    %c0_45 = arith.constant 0 : index
    %39 = vector.load %arg2[%c6, %c0_44, %c0_45] : memref<9x8x128xbf16, #tpu.memory_space<vmem>>, vector<1x8x128xbf16>
    %40 = vector.shape_cast %39 : vector<1x8x128xbf16> to vector<8x128xbf16>
    %cst_46 = arith.constant dense<0.000000e+00> : vector<64x128xf32>
    %41 = tpu.matmul %38, %40, %cst_46 {dimension_numbers = #tpu.dot_dimension_numbers<[1], [0], [0], [1], [0, 0, 1, 1], [], []>} : vector<64x8xbf16>, vector<8x128xbf16>, vector<64x128xf32> -> vector<64x128xf32>
    %42 = arith.addf %36, %41 : vector<64x128xf32>
    %c1_47 = arith.constant 1 : index
    %c0_48 = arith.constant 0 : index
    %c16_49 = arith.constant 16 : index
    %c0_50 = arith.constant 0 : index
    %43 = vector.load %arg1[%c1_47, %c0_48, %c16_49, %c0_50] : memref<3x1x80x8xbf16, #tpu.memory_space<vmem>>, vector<1x1x64x8xbf16>
    %44 = vector.shape_cast %43 : vector<1x1x64x8xbf16> to vector<64x8xbf16>
    %c7 = arith.constant 7 : index
    %c0_51 = arith.constant 0 : index
    %c0_52 = arith.constant 0 : index
    %45 = vector.load %arg2[%c7, %c0_51, %c0_52] : memref<9x8x128xbf16, #tpu.memory_space<vmem>>, vector<1x8x128xbf16>
    %46 = vector.shape_cast %45 : vector<1x8x128xbf16> to vector<8x128xbf16>
    %cst_53 = arith.constant dense<0.000000e+00> : vector<64x128xf32>
    %47 = tpu.matmul %44, %46, %cst_53 {dimension_numbers = #tpu.dot_dimension_numbers<[1], [0], [0], [1], [0, 0, 1, 1], [], []>} : vector<64x8xbf16>, vector<8x128xbf16>, vector<64x128xf32> -> vector<64x128xf32>
    %48 = arith.addf %42, %47 : vector<64x128xf32>
    %c2_54 = arith.constant 2 : index
    %c0_55 = arith.constant 0 : index
    %c16_56 = arith.constant 16 : index
    %c0_57 = arith.constant 0 : index
    %49 = vector.load %arg1[%c2_54, %c0_55, %c16_56, %c0_57] : memref<3x1x80x8xbf16, #tpu.memory_space<vmem>>, vector<1x1x64x8xbf16>
    %50 = vector.shape_cast %49 : vector<1x1x64x8xbf16> to vector<64x8xbf16>
    %c8_58 = arith.constant 8 : index
    %c0_59 = arith.constant 0 : index
    %c0_60 = arith.constant 0 : index
    %51 = vector.load %arg2[%c8_58, %c0_59, %c0_60] : memref<9x8x128xbf16, #tpu.memory_space<vmem>>, vector<1x8x128xbf16>
    %52 = vector.shape_cast %51 : vector<1x8x128xbf16> to vector<8x128xbf16>
    %cst_61 = arith.constant dense<0.000000e+00> : vector<64x128xf32>
    %53 = tpu.matmul %50, %52, %cst_61 {dimension_numbers = #tpu.dot_dimension_numbers<[1], [0], [0], [1], [0, 0, 1, 1], [], []>} : vector<64x8xbf16>, vector<8x128xbf16>, vector<64x128xf32> -> vector<64x128xf32>
    %54 = arith.addf %48, %53 : vector<64x128xf32>
    %cst_62 = arith.constant dense<0.000000e+00> : vector<128xf32>
    %55 = vector.multi_reduction <add>, %54, %cst_62 [0] : vector<64x128xf32> to vector<128xf32>
    %56 = vector.shape_cast %55 : vector<128xf32> to vector<1x128xf32>
    %c0_63 = arith.constant 0 : index
    %c0_64 = arith.constant 0 : index
    %c0_65 = arith.constant 0 : index
    %57 = vector.load %arg4[%c0_63, %c0_64, %c0_65] : memref<1x2x128xf32, #tpu.memory_space<vmem>>, vector<1x1x128xf32>
    %58 = vector.shape_cast %57 : vector<1x1x128xf32> to vector<1x128xf32>
    %59 = vector.shape_cast %56 : vector<1x128xf32> to vector<1x1x128xf32>
    tpu.vector_store %arg4[%c0_63, %c0_64, %c0_65], %59 {strides = array<i32>} : memref<1x2x128xf32, #tpu.memory_space<vmem>>, vector<1x1x128xf32>,
    %60 = arith.mulf %54, %54 : vector<64x128xf32>
    %cst_66 = arith.constant dense<0.000000e+00> : vector<128xf32>
    %61 = vector.multi_reduction <add>, %60, %cst_66 [0] : vector<64x128xf32> to vector<128xf32>
    %62 = vector.shape_cast %61 : vector<128xf32> to vector<1x128xf32>
    %c0_67 = arith.constant 0 : index
    %c1_68 = arith.constant 1 : index
    %c0_69 = arith.constant 0 : index
    %63 = vector.load %arg4[%c0_67, %c1_68, %c0_69] : memref<1x2x128xf32, #tpu.memory_space<vmem>>, vector<1x1x128xf32>
    %64 = vector.shape_cast %63 : vector<1x1x128xf32> to vector<1x128xf32>
    %65 = vector.shape_cast %62 : vector<1x128xf32> to vector<1x1x128xf32>
    tpu.vector_store %arg4[%c0_67, %c1_68, %c0_69], %65 {strides = array<i32>} : memref<1x2x128xf32, #tpu.memory_space<vmem>>, vector<1x1x128xf32>,
    %66 = arith.truncf %54 : vector<64x128xf32> to vector<64x128xbf16>
    %c0_70 = arith.constant 0 : index
    %c0_71 = arith.constant 0 : index
    %c0_72 = arith.constant 0 : index
    %67 = vector.load %arg3[%c0_70, %c0_71, %c0_72] : memref<1x64x128xbf16, #tpu.memory_space<vmem>>, vector<1x64x128xbf16>
    %68 = vector.shape_cast %67 : vector<1x64x128xbf16> to vector<64x128xbf16>
    %69 = vector.shape_cast %66 : vector<64x128xbf16> to vector<1x64x128xbf16>
    tpu.vector_store %arg3[%c0_70, %c0_71, %c0_72], %69 {strides = array<i32>} : memref<1x64x128xbf16, #tpu.memory_space<vmem>>, vector<1x64x128xbf16>,
    return
  }
  func.func @transform_0(%arg0: i32) -> (i32, i32, i32, i32) {
    %c0_i32 = arith.constant 0 : i32
    %c0_i32_0 = arith.constant 0 : i32
    %c0_i32_1 = arith.constant 0 : i32
    %c0_i32_2 = arith.constant 0 : i32
    return %c0_i32, %arg0, %c0_i32_0, %c0_i32_1 : i32, i32, i32, i32
  }
  func.func @transform_1(%arg0: i32) -> (i32, i32, i32) {
    %c0_i32 = arith.constant 0 : i32
    %c0_i32_0 = arith.constant 0 : i32
    %c0_i32_1 = arith.constant 0 : i32
    %c0_i32_2 = arith.constant 0 : i32
    return %c0_i32, %c0_i32_0, %c0_i32_1 : i32, i32, i32
  }
  func.func @transform_2(%arg0: i32) -> (i32, i32, i32) {
    %c0_i32 = arith.constant 0 : i32
    %c0_i32_0 = arith.constant 0 : i32
    %c0_i32_1 = arith.constant 0 : i32
    return %arg0, %c0_i32, %c0_i32_0 : i32, i32, i32
  }
  func.func @transform_3(%arg0: i32) -> (i32, i32, i32) {
    %c0_i32 = arith.constant 0 : i32
    %c0_i32_0 = arith.constant 0 : i32
    %c0_i32_1 = arith.constant 0 : i32
    return %arg0, %c0_i32, %c0_i32_0 : i32, i32, i32
  }
}

module attributes {stable_mosaic.version = 11 : i64} {
  func.func @_conv_stats_kernel(%arg0: i32, %arg1: memref<1x1x64x4xbf16, #tpu.memory_space<vmem>>, %arg2: memref<1x4x128xbf16, #tpu.memory_space<vmem>>, %arg3: memref<1x64x128xbf16, #tpu.memory_space<vmem>>, %arg4: memref<1x2x128xf32, #tpu.memory_space<vmem>>) attributes {dimension_semantics = [#tpu.dimension_semantics<parallel>], iteration_bounds = array<i64: 2>, scalar_prefetch = 0 : i64, scratch_operands = 0 : i64, tpu.core_type = #tpu.core_type<tc>, window_params = [{transform_indices = @transform_0, window_bounds = array<i64: 1, 1, 64, 4>}, {pipeline_mode = #tpu.pipeline_mode<synchronous>, transform_indices = @transform_1, window_bounds = array<i64: 1, 4, 128>}, {transform_indices = @transform_2, window_bounds = array<i64: 1, 64, 128>}, {transform_indices = @transform_3, window_bounds = array<i64: 1, 2, 128>}]} {
    %cst = arith.constant 0.000000e+00 : f32
    %0 = vector.broadcast %cst : f32 to vector<64x128xf32>
    %c0 = arith.constant 0 : index
    %c0_0 = arith.constant 0 : index
    %c0_1 = arith.constant 0 : index
    %c0_2 = arith.constant 0 : index
    %1 = vector.load %arg1[%c0, %c0_0, %c0_1, %c0_2] : memref<1x1x64x4xbf16, #tpu.memory_space<vmem>>, vector<1x1x64x4xbf16>
    %2 = vector.shape_cast %1 : vector<1x1x64x4xbf16> to vector<64x4xbf16>
    %c0_3 = arith.constant 0 : index
    %c0_4 = arith.constant 0 : index
    %c0_5 = arith.constant 0 : index
    %3 = vector.load %arg2[%c0_3, %c0_4, %c0_5] : memref<1x4x128xbf16, #tpu.memory_space<vmem>>, vector<1x4x128xbf16>
    %4 = vector.shape_cast %3 : vector<1x4x128xbf16> to vector<4x128xbf16>
    %cst_6 = arith.constant dense<0.000000e+00> : vector<64x128xf32>
    %5 = tpu.matmul %2, %4, %cst_6 {dimension_numbers = #tpu.dot_dimension_numbers<[1], [0], [0], [1], [0, 0, 1, 1], [], []>} : vector<64x4xbf16>, vector<4x128xbf16>, vector<64x128xf32> -> vector<64x128xf32>
    %6 = arith.addf %0, %5 : vector<64x128xf32>
    %cst_7 = arith.constant dense<0.000000e+00> : vector<128xf32>
    %7 = vector.multi_reduction <add>, %6, %cst_7 [0] : vector<64x128xf32> to vector<128xf32>
    %8 = vector.shape_cast %7 : vector<128xf32> to vector<1x128xf32>
    %c0_8 = arith.constant 0 : index
    %c0_9 = arith.constant 0 : index
    %c0_10 = arith.constant 0 : index
    %9 = vector.load %arg4[%c0_8, %c0_9, %c0_10] : memref<1x2x128xf32, #tpu.memory_space<vmem>>, vector<1x1x128xf32>
    %10 = vector.shape_cast %9 : vector<1x1x128xf32> to vector<1x128xf32>
    %11 = vector.shape_cast %8 : vector<1x128xf32> to vector<1x1x128xf32>
    tpu.vector_store %arg4[%c0_8, %c0_9, %c0_10], %11 {strides = array<i32>} : memref<1x2x128xf32, #tpu.memory_space<vmem>>, vector<1x1x128xf32>,
    %12 = arith.mulf %6, %6 : vector<64x128xf32>
    %cst_11 = arith.constant dense<0.000000e+00> : vector<128xf32>
    %13 = vector.multi_reduction <add>, %12, %cst_11 [0] : vector<64x128xf32> to vector<128xf32>
    %14 = vector.shape_cast %13 : vector<128xf32> to vector<1x128xf32>
    %c0_12 = arith.constant 0 : index
    %c1 = arith.constant 1 : index
    %c0_13 = arith.constant 0 : index
    %15 = vector.load %arg4[%c0_12, %c1, %c0_13] : memref<1x2x128xf32, #tpu.memory_space<vmem>>, vector<1x1x128xf32>
    %16 = vector.shape_cast %15 : vector<1x1x128xf32> to vector<1x128xf32>
    %17 = vector.shape_cast %14 : vector<1x128xf32> to vector<1x1x128xf32>
    tpu.vector_store %arg4[%c0_12, %c1, %c0_13], %17 {strides = array<i32>} : memref<1x2x128xf32, #tpu.memory_space<vmem>>, vector<1x1x128xf32>,
    %18 = arith.truncf %6 : vector<64x128xf32> to vector<64x128xbf16>
    %c0_14 = arith.constant 0 : index
    %c0_15 = arith.constant 0 : index
    %c0_16 = arith.constant 0 : index
    %19 = vector.load %arg3[%c0_14, %c0_15, %c0_16] : memref<1x64x128xbf16, #tpu.memory_space<vmem>>, vector<1x64x128xbf16>
    %20 = vector.shape_cast %19 : vector<1x64x128xbf16> to vector<64x128xbf16>
    %21 = vector.shape_cast %18 : vector<64x128xbf16> to vector<1x64x128xbf16>
    tpu.vector_store %arg3[%c0_14, %c0_15, %c0_16], %21 {strides = array<i32>} : memref<1x64x128xbf16, #tpu.memory_space<vmem>>, vector<1x64x128xbf16>,
    return
  }
  func.func @transform_0(%arg0: i32) -> (i32, i32, i32, i32) {
    %c0_i32 = arith.constant 0 : i32
    %c0_i32_0 = arith.constant 0 : i32
    %c0_i32_1 = arith.constant 0 : i32
    %c0_i32_2 = arith.constant 0 : i32
    return %c0_i32, %arg0, %c0_i32_0, %c0_i32_1 : i32, i32, i32, i32
  }
  func.func @transform_1(%arg0: i32) -> (i32, i32, i32) {
    %c0_i32 = arith.constant 0 : i32
    %c0_i32_0 = arith.constant 0 : i32
    %c0_i32_1 = arith.constant 0 : i32
    %c0_i32_2 = arith.constant 0 : i32
    return %c0_i32, %c0_i32_0, %c0_i32_1 : i32, i32, i32
  }
  func.func @transform_2(%arg0: i32) -> (i32, i32, i32) {
    %c0_i32 = arith.constant 0 : i32
    %c0_i32_0 = arith.constant 0 : i32
    %c0_i32_1 = arith.constant 0 : i32
    return %arg0, %c0_i32, %c0_i32_0 : i32, i32, i32
  }
  func.func @transform_3(%arg0: i32) -> (i32, i32, i32) {
    %c0_i32 = arith.constant 0 : i32
    %c0_i32_0 = arith.constant 0 : i32
    %c0_i32_1 = arith.constant 0 : i32
    return %arg0, %c0_i32, %c0_i32_0 : i32, i32, i32
  }
}

module attributes {stable_mosaic.version = 11 : i64} {
  func.func @_affine_add_relu_kernel(%arg0: i32, %arg1: memref<64x128xbf16, #tpu.memory_space<vmem>>, %arg2: memref<64x128xbf16, #tpu.memory_space<vmem>>, %arg3: memref<1x128xf32, #tpu.memory_space<vmem>>, %arg4: memref<1x128xf32, #tpu.memory_space<vmem>>, %arg5: memref<1x128xf32, #tpu.memory_space<vmem>>, %arg6: memref<1x128xf32, #tpu.memory_space<vmem>>, %arg7: memref<64x128xbf16, #tpu.memory_space<vmem>>) attributes {dimension_semantics = [#tpu.dimension_semantics<parallel>], iteration_bounds = array<i64: 2>, scalar_prefetch = 0 : i64, scratch_operands = 0 : i64, tpu.core_type = #tpu.core_type<tc>, window_params = [{transform_indices = @transform_0, window_bounds = array<i64: 64, 128>}, {transform_indices = @transform_1, window_bounds = array<i64: 64, 128>}, {pipeline_mode = #tpu.pipeline_mode<synchronous>, transform_indices = @transform_2, window_bounds = array<i64: 1, 128>}, {pipeline_mode = #tpu.pipeline_mode<synchronous>, transform_indices = @transform_3, window_bounds = array<i64: 1, 128>}, {pipeline_mode = #tpu.pipeline_mode<synchronous>, transform_indices = @transform_4, window_bounds = array<i64: 1, 128>}, {pipeline_mode = #tpu.pipeline_mode<synchronous>, transform_indices = @transform_5, window_bounds = array<i64: 1, 128>}, {transform_indices = @transform_6, window_bounds = array<i64: 64, 128>}]} {
    %c0 = arith.constant 0 : index
    %c0_0 = arith.constant 0 : index
    %0 = vector.load %arg1[%c0, %c0_0] : memref<64x128xbf16, #tpu.memory_space<vmem>>, vector<64x128xbf16>
    %1 = arith.extf %0 : vector<64x128xbf16> to vector<64x128xf32>
    %c0_1 = arith.constant 0 : index
    %c0_2 = arith.constant 0 : index
    %2 = vector.load %arg2[%c0_1, %c0_2] : memref<64x128xbf16, #tpu.memory_space<vmem>>, vector<64x128xbf16>
    %3 = arith.extf %2 : vector<64x128xbf16> to vector<64x128xf32>
    %c0_3 = arith.constant 0 : index
    %c0_4 = arith.constant 0 : index
    %4 = vector.load %arg3[%c0_3, %c0_4] : memref<1x128xf32, #tpu.memory_space<vmem>>, vector<1x128xf32>
    %5 = vector.broadcast %4 : vector<1x128xf32> to vector<64x128xf32>
    %6 = arith.mulf %1, %5 : vector<64x128xf32>
    %c0_5 = arith.constant 0 : index
    %c0_6 = arith.constant 0 : index
    %7 = vector.load %arg4[%c0_5, %c0_6] : memref<1x128xf32, #tpu.memory_space<vmem>>, vector<1x128xf32>
    %8 = vector.broadcast %7 : vector<1x128xf32> to vector<64x128xf32>
    %9 = arith.addf %6, %8 : vector<64x128xf32>
    %c0_7 = arith.constant 0 : index
    %c0_8 = arith.constant 0 : index
    %10 = vector.load %arg5[%c0_7, %c0_8] : memref<1x128xf32, #tpu.memory_space<vmem>>, vector<1x128xf32>
    %11 = vector.broadcast %10 : vector<1x128xf32> to vector<64x128xf32>
    %12 = arith.mulf %3, %11 : vector<64x128xf32>
    %13 = arith.addf %9, %12 : vector<64x128xf32>
    %c0_9 = arith.constant 0 : index
    %c0_10 = arith.constant 0 : index
    %14 = vector.load %arg6[%c0_9, %c0_10] : memref<1x128xf32, #tpu.memory_space<vmem>>, vector<1x128xf32>
    %15 = vector.broadcast %14 : vector<1x128xf32> to vector<64x128xf32>
    %16 = arith.addf %13, %15 : vector<64x128xf32>
    %cst = arith.constant 0.000000e+00 : f32
    %17 = vector.broadcast %cst : f32 to vector<64x128xf32>
    %18 = arith.maximumf %16, %17 : vector<64x128xf32>
    %19 = arith.truncf %18 : vector<64x128xf32> to vector<64x128xbf16>
    %c0_11 = arith.constant 0 : index
    %c0_12 = arith.constant 0 : index
    %20 = vector.load %arg7[%c0_11, %c0_12] : memref<64x128xbf16, #tpu.memory_space<vmem>>, vector<64x128xbf16>
    tpu.vector_store %arg7[%c0_11, %c0_12], %19 {strides = array<i32>} : memref<64x128xbf16, #tpu.memory_space<vmem>>, vector<64x128xbf16>,
    return
  }
  func.func @transform_0(%arg0: i32) -> (i32, i32) {
    %c0_i32 = arith.constant 0 : i32
    %c0_i32_0 = arith.constant 0 : i32
    return %arg0, %c0_i32 : i32, i32
  }
  func.func @transform_1(%arg0: i32) -> (i32, i32) {
    %c0_i32 = arith.constant 0 : i32
    %c0_i32_0 = arith.constant 0 : i32
    return %arg0, %c0_i32 : i32, i32
  }
  func.func @transform_2(%arg0: i32) -> (i32, i32) {
    %c0_i32 = arith.constant 0 : i32
    %c0_i32_0 = arith.constant 0 : i32
    %c0_i32_1 = arith.constant 0 : i32
    return %c0_i32, %c0_i32_0 : i32, i32
  }
  func.func @transform_3(%arg0: i32) -> (i32, i32) {
    %c0_i32 = arith.constant 0 : i32
    %c0_i32_0 = arith.constant 0 : i32
    %c0_i32_1 = arith.constant 0 : i32
    return %c0_i32, %c0_i32_0 : i32, i32
  }
  func.func @transform_4(%arg0: i32) -> (i32, i32) {
    %c0_i32 = arith.constant 0 : i32
    %c0_i32_0 = arith.constant 0 : i32
    %c0_i32_1 = arith.constant 0 : i32
    return %c0_i32, %c0_i32_0 : i32, i32
  }
  func.func @transform_5(%arg0: i32) -> (i32, i32) {
    %c0_i32 = arith.constant 0 : i32
    %c0_i32_0 = arith.constant 0 : i32
    %c0_i32_1 = arith.constant 0 : i32
    return %c0_i32, %c0_i32_0 : i32, i32
  }
  func.func @transform_6(%arg0: i32) -> (i32, i32) {
    %c0_i32 = arith.constant 0 : i32
    %c0_i32_0 = arith.constant 0 : i32
    return %arg0, %c0_i32 : i32, i32
  }
}

</mosaic_0001>

<bundles_post_ra>
// kernel: basic_block_forward.6
= control target key start
LH: loop header
LB: loop body
LE: loop exit
PB: predicated region body
PF: predicated region fallthrough
CT: control target
= control target key end

     0   :  { %s431_s12 = smov 0   ;;  %s461_s0 = inlined_call_operand.vmem [shape: bf16[128,128], index: 0, kind: input, shape index: {}]   ;;  %s462_s1 = inlined_call_operand.vmem [shape: f32[1,128], index: 1, kind: input, shape index: {}]   ;;  %s463_s2 = inlined_call_operand.vmem [shape: f32[1,128], index: 2, kind: input, shape index: {}]   ;;  %s464_s3 = inlined_call_operand.vmem [shape: bf16[128,128], index: 3, kind: output, shape index: {}]  }
   0x1 LB: > { %s324_s13 = sadd.s32 4294967295, %s409_s12   ;;  %p328_p0 = scmp.ge.s32.totalorder %s409_s12, 1  ;;  %s409_s12 = sphi %s431_s12, %s13_s12  }
   0x2   : > { %p138_p1 = scmp.lt.s32.totalorder %s409_s12, 3 }
   0x4   : > { %p139_p2 = pnand %p328_p0, %p138_p1 }
   0x5   : > { %s329_s14 = sshll.u32 (!%p139_p2), %s324_s13, 3 }
   0x6   : > { %142 = sbr.rel (%p139_p2) target bundleno = 27 (0x1b), region = 32  ;;  %p163_p3 = scmp.lt.s32.totalorder (!%p139_p2), %s329_s14, 15 }
   0xb   : > { %s466_s14 = smov (!%p163_p3, %s329_s14), 15  ;;  %v333_v0 = vld [vmem:[%s462_s1] ss:$0 sm:$0xff] }
   0xc   : > { %s330_s15 = sshll.u32 %s466_s14, 2  ;;  %v334_v9 = vld [vmem:[%s463_s2] ss:$0 sm:$0xff] }
   0xd   : > { %s166_s18 = scalar_lea.vmem %s461_s0, %s330_s15  ;;  %s172_s25 = scalar_lea.vmem %s464_s3, %s330_s15 }
   0xe   : > { %v354_v1 = vld [vmem:[%s166_s18] sm:$0xff]   ;;  %v389_v2 = vld [vmem:[%s166_s18 + $0x8] sm:$0xff]   ;;  %v390_v3 = vld [vmem:[%s166_s18 + $0x10] sm:$0xff]  }
   0xf   : > { %v355_v4 = vunpack.c.l.bf16 %v354_v1  ;;  %v356_v5 = vunpack.c.h.bf16 %v354_v1  ;;  %v359_v6 = vunpack.c.l.bf16 %v389_v2  ;;  %v360_v7 = vunpack.c.h.bf16 %v389_v2  ;;  %v391_v8 = vld [vmem:[%s166_s18 + $0x18] sm:$0xff]  }
  0x10   : > { %v363_v10 = vunpack.c.l.bf16 %v390_v3  ;;  %v364_v11 = vunpack.c.h.bf16 %v390_v3  ;;  %v367_v12 = vunpack.c.l.bf16 %v391_v8  ;;  %v368_v13 = vunpack.c.h.bf16 %v391_v8 }
  0x11   : > { %v197_v14 = vmul.f32 %v355_v4, %v333_v0  ;;  %v198_v15 = vmul.f32 %v356_v5, %v333_v0  ;;  %v199_v16 = vmul.f32 %v359_v6, %v333_v0  ;;  %v200_v17 = vmul.f32 %v360_v7, %v333_v0 }
  0x12   : > { %v201_v18 = vmul.f32 %v363_v10, %v333_v0  ;;  %v202_v19 = vmul.f32 %v364_v11, %v333_v0  ;;  %v203_v20 = vmul.f32 %v367_v12, %v333_v0  ;;  %v204_v21 = vmul.f32 %v368_v13, %v333_v0 }
  0x13   : > { %v212_v22 = vadd.f32 %v334_v9, %v197_v14  ;;  %v213_v23 = vadd.f32 %v334_v9, %v198_v15  ;;  %v214_v24 = vadd.f32 %v334_v9, %v199_v16  ;;  %v215_v25 = vadd.f32 %v334_v9, %v200_v17 }
  0x14   : > { %v216_v26 = vadd.f32 %v334_v9, %v201_v18  ;;  %v217_v27 = vadd.f32 %v334_v9, %v202_v19  ;;  %v218_v28 = vadd.f32 %v334_v9, %v203_v20  ;;  %v219_v29 = vadd.f32 %v334_v9, %v204_v21 }
  0x15   : > { %v220_v30 = vmax.f32 %v212_v22, 0.0  ;;  %v221_v31 = vmax.f32 %v213_v23, 0.0  ;;  %v222_v32 = vmax.f32 %v214_v24, 0.0  ;;  %v223_v33 = vmax.f32 %v215_v25, 0.0 }
  0x16   : > { %v224_v34 = vmax.f32 %v216_v26, 0.0  ;;  %v225_v35 = vmax.f32 %v217_v27, 0.0  ;;  %v226_v36 = vmax.f32 %v218_v28, 0.0  ;;  %v227_v37 = vmax.f32 %v219_v29, 0.0 }
  0x17   : > { %v372_v38 = vpack.c.bf16 %v221_v31, %v220_v30  ;;  %v377_v39 = vpack.c.bf16 %v223_v33, %v222_v32 }
  0x18   : > { %v382_v40 = vpack.c.bf16 %v225_v35, %v224_v34  ;;  %v387_v41 = vpack.c.bf16 %v227_v37, %v226_v36 }
  0x19   : > { %373 = vst [vmem:[%s172_s25] sm:$0xff] %v372_v38   ;;  %392 = vst [vmem:[%s172_s25 + $0x8] sm:$0xff] %v377_v39  }
  0x1a   : > { %393 = vst [vmem:[%s172_s25 + $0x10] sm:$0xff] %v382_v40   ;;  %394 = vst [vmem:[%s172_s25 + $0x18] sm:$0xff] %v387_v41  }
  0x1b PF: > { %s13_s12 = sadd.s32 1, %s409_s12  }
  0x1c   : > { %p10_p4 = scmp.ge.s32.totalorder %s13_s12, 4  }
  0x1e   :  { %12 = sbr.rel (!%p10_p4) target bundleno = 1 (0x1), region = 62 }

// kernel: basic_block_forward.5
= control target key start
LH: loop header
LB: loop body
LE: loop exit
PB: predicated region body
PF: predicated region fallthrough
CT: control target
= control target key end

     0   :  { %s2100_s12 = smov 0   ;;  %s2102_s13 = smov 0   ;;  %s2375_s0 = inlined_call_operand.vmem [shape: bf16[6,2,72,4], index: 0, kind: input, shape index: {}]   ;;  %s2376_s1 = inlined_call_operand.vmem [shape: bf16[9,4,128], index: 1, kind: input, shape index: {}]   ;;  %s2377_s2 = inlined_call_operand.vmem [shape: bf16[2,64,128], index: 2, kind: output, shape index: {0}]   ;;  %s2378_s3 = inlined_call_operand.vmem [shape: f32[2,2,128], index: 3, kind: output, shape index: {1}]  }
   0x1   :  { %s2104_s14 = smov 0  }
   0x2 LB: > { %s1659_s15 = sadd.s32 4294967295, %s2078_s14   ;;  %s2117_s16 = sadd.s32 1, %s2078_s14   ;;  %s2078_s14 = sphi %s2104_s14, %s2382_s14   ;;  %s2074_s13 = sphi %s2102_s13, %s2381_s13   ;;  %s2070_s12 = sphi %s2100_s12, %s2380_s12  }
   0x3   : > { %s18_s17 = ssub.s32 %s2078_s14, %s2117_s16  ;;  %s21_s18 = sadd.s32 1, %s2074_s13 }
   0x4   : > { %p19_p0 = scmp.eq.s32.totalorder %s18_s17, 0  ;;  %p28_p1 = scmp.ne.s32.totalorder %s2074_s13, %s2070_s12 }
   0x5   : > { %p29_p2 = scmp.eq.s32.totalorder %s2078_s14, 0  ;;  %p1662_p4 = scmp.ge.s32.totalorder %s2078_s14, 2 }
   0x6   : > { %s2126_s19 = scalar_select %p19_p0, %s2074_s13, %s21_s18  }
   0x7   : > { %p30_p3 = por %p29_p2, %p28_p1  ;;  %130 = sbr.rel (%p1662_p4) target bundleno = 32 (0x20), region = 20 }
   0xc   : > { %133 = sbr.rel (!%p30_p3) target bundleno = 32 (0x20), region = 24  ;;  %s135_s20 = sand.u32 (%p30_p3), 1, %s2074_s13  }
   0xd   : > { %s1994_s21 = smul.u32 (%p30_p3), 36, %s2078_s14 }
   0xe   : > { %s1993_s22 = smul.u32 (%p30_p3), 216, %s135_s20 }
   0xf   : > { %s2134_s25 = scalar_lea.vmem (%p30_p3), %s2375_s0, %s1994_s21 }
  0x10   : > { %v157_v0 = vld [vmem:[%s2134_s25] sm:$0xff] (%p30_p3)   ;;  %v161_v1 = vld [vmem:[%s2134_s25 + $0x8] sm:$0xff] (%p30_p3)   ;;  %v165_v2 = vld [vmem:[%s2134_s25 + $0x10] sm:$0xff] (%p30_p3)   ;;  %s2139_s26 = scalar_lea.vmem (%p30_p3), [#allocation2], %s1993_s22 }
  0x11   : > { %158 = vst [vmem:[%s2139_s26] sm:$0xff] %v157_v0   ;;  %162 = vst [vmem:[%s2139_s26 + $0x8] sm:$0xff] %v161_v1   ;;  %v169_v3 = vld [vmem:[%s2134_s25 + $0x18] sm:$0xff]   ;;  %v173_v4 = vld [vmem:[%s2134_s25 + $0x20] sm:$0xf] }
  0x12   : > { %166 = vst [vmem:[%s2139_s26 + $0x10] sm:$0xff] %v165_v2   ;;  %v175_v5 = vld [vmem:[%s2134_s25 + $0x48] sm:$0xff]   ;;  %170 = vst [vmem:[%s2139_s26 + $0x18] sm:$0xff] %v169_v3   ;;  %v179_v6 = vld [vmem:[%s2134_s25 + $0x50] sm:$0xff]  }
  0x13   : > { %174 = vst [vmem:[%s2139_s26 + $0x20] sm:$0xf] %v173_v4  ;;  %176 = vst [vmem:[%s2139_s26 + $0x24] sm:$0xff] %v175_v5   ;;  %v183_v7 = vld [vmem:[%s2134_s25 + $0x58] sm:$0xff]   ;;  %v187_v8 = vld [vmem:[%s2134_s25 + $0x60] sm:$0xff]  }
  0x14   : > { %180 = vst [vmem:[%s2139_s26 + $0x2c] sm:$0xff] %v179_v6   ;;  %184 = vst [vmem:[%s2139_s26 + $0x34] sm:$0xff] %v183_v7   ;;  %v191_v9 = vld [vmem:[%s2134_s25 + $0x68] sm:$0xf]  ;;  %v193_v10 = vld [vmem:[%s2134_s25 + $0x90] sm:$0xff]  }
  0x15   : > { %188 = vst [vmem:[%s2139_s26 + $0x3c] sm:$0xff] %v187_v8   ;;  %v197_v11 = vld [vmem:[%s2134_s25 + $0x98] sm:$0xff]   ;;  %192 = vst [vmem:[%s2139_s26 + $0x44] sm:$0xf] %v191_v9  ;;  %v201_v12 = vld [vmem:[%s2134_s25 + $0xa0] sm:$0xff]  }
  0x16   : > { %194 = vst [vmem:[%s2139_s26 + $0x48] sm:$0xff] %v193_v10   ;;  %198 = vst [vmem:[%s2139_s26 + $0x50] sm:$0xff] %v197_v11   ;;  %v205_v13 = vld [vmem:[%s2134_s25 + $0xa8] sm:$0xff]   ;;  %v209_v14 = vld [vmem:[%s2134_s25 + $0xb0] sm:$0xf] }
  0x17   : > { %202 = vst [vmem:[%s2139_s26 + $0x58] sm:$0xff] %v201_v12   ;;  %206 = vst [vmem:[%s2139_s26 + $0x60] sm:$0xff] %v205_v13   ;;  %v211_v15 = vld [vmem:[%s2134_s25 + $0xd8] sm:$0xff]   ;;  %v215_v16 = vld [vmem:[%s2134_s25 + $0xe0] sm:$0xff]  }
  0x18   : > { %210 = vst [vmem:[%s2139_s26 + $0x68] sm:$0xf] %v209_v14  ;;  %v219_v17 = vld [vmem:[%s2134_s25 + $0xe8] sm:$0xff]   ;;  %212 = vst [vmem:[%s2139_s26 + $0x6c] sm:$0xff] %v211_v15   ;;  %v223_v18 = vld [vmem:[%s2134_s25 + $0xf0] sm:$0xff]  }
  0x19   : > { %216 = vst [vmem:[%s2139_s26 + $0x74] sm:$0xff] %v215_v16   ;;  %220 = vst [vmem:[%s2139_s26 + $0x7c] sm:$0xff] %v219_v17   ;;  %v227_v19 = vld [vmem:[%s2134_s25 + $0xf8] sm:$0xf]  ;;  %v229_v20 = vld [vmem:[%s2134_s25 + $0x120] sm:$0xff]  }
  0x1a   : > { %224 = vst [vmem:[%s2139_s26 + $0x84] sm:$0xff] %v223_v18   ;;  %228 = vst [vmem:[%s2139_s26 + $0x8c] sm:$0xf] %v227_v19  ;;  %v233_v21 = vld [vmem:[%s2134_s25 + $0x128] sm:$0xff]   ;;  %v237_v22 = vld [vmem:[%s2134_s25 + $0x130] sm:$0xff]  }
  0x1b   : > { %230 = vst [vmem:[%s2139_s26 + $0x90] sm:$0xff] %v229_v20   ;;  %v241_v23 = vld [vmem:[%s2134_s25 + $0x138] sm:$0xff]   ;;  %234 = vst [vmem:[%s2139_s26 + $0x98] sm:$0xff] %v233_v21   ;;  %v245_v24 = vld [vmem:[%s2134_s25 + $0x140] sm:$0xf] }
  0x1c   : > { %238 = vst [vmem:[%s2139_s26 + $0xa0] sm:$0xff] %v237_v22   ;;  %242 = vst [vmem:[%s2139_s26 + $0xa8] sm:$0xff] %v241_v23   ;;  %v247_v25 = vld [vmem:[%s2134_s25 + $0x168] sm:$0xff]   ;;  %v251_v26 = vld [vmem:[%s2134_s25 + $0x170] sm:$0xff]  }
  0x1d   : > { %246 = vst [vmem:[%s2139_s26 + $0xb0] sm:$0xf] %v245_v24  ;;  %248 = vst [vmem:[%s2139_s26 + $0xb4] sm:$0xff] %v247_v25   ;;  %v255_v27 = vld [vmem:[%s2134_s25 + $0x178] sm:$0xff]   ;;  %v259_v28 = vld [vmem:[%s2134_s25 + $0x180] sm:$0xff]  }
  0x1e   : > { %252 = vst [vmem:[%s2139_s26 + $0xbc] sm:$0xff] %v251_v26   ;;  %v263_v29 = vld [vmem:[%s2134_s25 + $0x188] sm:$0xf]  ;;  %256 = vst [vmem:[%s2139_s26 + $0xc4] sm:$0xff] %v255_v27  }
  0x1f   : > { %260 = vst [vmem:[%s2139_s26 + $0xcc] sm:$0xff] %v259_v28   ;;  %264 = vst [vmem:[%s2139_s26 + $0xd4] sm:$0xf] %v263_v29 }
  0x20 PF: > { %p1664_p5 = scmp.ge.s32.totalorder %s2078_s14, 1  ;;  %p395_p6 = scmp.lt.s32.totalorder %s2078_s14, 3 }
  0x22   : > { %p396_p7 = pnand %p1664_p5, %p395_p6 }
  0x23   : > { %s402_s29 = sand.u32 (!%p396_p7), 1, %s2070_s12   ;;  %p2336_p8 = scmp.lt.s32.totalorder (!%p396_p7), %s1659_s15, 1 }
  0x24   : > { %399 = sbr.rel (%p396_p7) target bundleno = 334 (0x14e), region = 65 }
  0x25   : > { %s1995_s30 = smul.u32 (!%p396_p7), 216, %s402_s29 }
  0x27   : > { %s2215_s8 = scalar_lea.vmem (!%p396_p7), [#allocation2], %s1995_s30 }
  0x29   : > { %v1676_v30 = vld [vmem:[%s2376_s1 + $0x2] sm:$0x3]  ;;  %vm492_vm0 = vcmask 1041408   ;;  %v447_v32 = vld [vmem:[%s2376_s1] sm:$0x3]  ;;  %vm479_vm1 = vcmask 31744  }
  0x2a   : > { %1984 = vmatprep.subr.msk.bf16.mxu1 %vm492_vm0, %v1676_v30  ;;  %1983 = vmatprep.subr.msk.bf16.mxu0 %vm492_vm0, %v1676_v30  ;;  %v494_v31 = vsel %vm492_vm0, %v1676_v30, 0  ;;  %v1701_v33 = vld [vmem:[%s2376_s1 + $0x4] sm:$0x3]  ;;  %v2021_v35 = vld [vmem:[%s2215_s8 + $0x58] sm:$0xff]   ;;  %v2022_v36 = vld [vmem:[%s2215_s8 + $0x50] sm:$0xff]   ;;  %v594_v40 = vsel %vm492_vm0, %v447_v32, 0 }
  0x2b   : > { %1982 = vmatpush3.bf16.msra.mxu1 %v494_v31  ;;  %1892 = vmatpush3.bf16.msra.mxu0 %v494_v31  ;;  %v2020_v34 = vld [vmem:[%s2215_s8 + $0x48] sm:$0xff]   ;;  %v705_v37 = vsel %vm492_vm0, %v1701_v33, 0  ;;  %v2023_v39 = vld [vmem:[%s2215_s8 + $0x60] sm:$0xff]   ;;  %v2025_v43 = vld [vmem:[%s2215_s8 + $0x90] sm:$0xff]   ;;  %s2384_s15 = smov (!%p2336_p8, %s1659_s15), 1 }
  0x2c   : > { %1985 = vmatprep.subr.msk.bf16.mxu1 %vm492_vm0, %v447_v32  ;;  %1986 = vmatprep.subr.msk.bf16.mxu0 %vm492_vm0, %v1701_v33  ;;  %v1718_v38 = vld [vmem:[%s2376_s1 + $0x6] sm:$0x3]  ;;  %v1735_v41 = vld [vmem:[%s2376_s1 + $0x8] sm:$0x3]  ;;  %v2027_v44 = vld [vmem:[%s2215_s8 + $0x98] sm:$0xff]   ;;  %s1814_s14 = sshll.u32 %s2384_s15, 5 }
  0x2d   : > { %1893 = vmatprep.mubr.msk.bf16.mxu0 %vm479_vm1, %v2020_v34  ;;  %1897 = vmatprep.mubr.msk.bf16.mxu1 %vm479_vm1, %v2021_v35  ;;  %v2024_v42 = vld [vmem:[%s2215_s8] sm:$0xff]   ;;  %v2026_v45 = vld [vmem:[%s2215_s8 + $0x8] sm:$0xff]   ;;  %v943_v46 = vsel %vm492_vm0, %v1735_v41, 0  ;;  %v2028_v47 = vld [vmem:[%s2215_s8 + $0x10] sm:$0xff]   ;;  %v824_v48 = vsel %vm492_vm0, %v1718_v38, 0  ;;  %s2354_s29 = scalar_lea.vmem %s2377_s2, %s1814_s14  ;;  %s1667_s30 = sshll.u32 %s2384_s15, 1 }
  0x2e   : > { %1894 = vmatmul.mubr.msk.bf16.vlgmr.msra.gmra.mxu0 %vm479_vm1, %v2022_v36  ;;  %1898 = vmatmul.mubr.msk.bf16.vlgmr.msra.gmra.mxu1 %vm479_vm1, %v2023_v39  ;;  %v2029_v49 = vld [vmem:[%s2215_s8 + $0xa0] sm:$0xff]   ;;  %v1752_v50 = vld [vmem:[%s2376_s1 + $0xa] sm:$0x3]  ;;  %v2030_v51 = vld [vmem:[%s2215_s8 + $0x18] sm:$0xff]   ;;  %s437_s6 = scalar_lea.vmem %s2378_s3, %s1667_s30 }
  0x2f   : > { %1912 = vmatpush3.bf16.msra.mxu0 %v705_v37  ;;  %1902 = vmatpush3.bf16.msra.mxu1 %v594_v40  ;;  %v2031_v52 = vld [vmem:[%s2215_s8 + $0xa8] sm:$0xff]   ;;  %v2035_v56 = vld [vmem:[%s2215_s8 + $0x74] sm:$0xff]   ;;  %v1062_v60 = vsel %vm492_vm0, %v1752_v50, 0  ;;  %v2037_v61 = vld [vmem:[%s2215_s8 + $0x7c] sm:$0xff]  }
  0x30   : > { %1903 = vmatprep.mubr.msk.bf16.mxu1 %vm479_vm1, %v2024_v42  ;;  %1913 = vmatprep.mubr.msk.bf16.mxu0 %vm479_vm1, %v2025_v43  ;;  %v1761_v53 = vld [vmem:[%s2376_s1 + $0xc] sm:$0x3]  ;;  %v2032_v55 = vld [vmem:[%s2215_s8 + $0x24] sm:$0xff]   ;;  %v1778_v62 = vld [vmem:[%s2376_s1 + $0xe] sm:$0x3] }
  0x31   : > { %1987 = vmatprep.subr.msk.bf16.mxu1 %vm492_vm0, %v1718_v38  ;;  %1988 = vmatprep.subr.msk.bf16.mxu0 %vm492_vm0, %v1735_v41  ;;  %v2033_v54 = vld [vmem:[%s2215_s8 + $0x6c] sm:$0xff]   ;;  %v1180_v58 = vsel %vm492_vm0, %v1761_v53, 0  ;;  %v2036_v59 = vld [vmem:[%s2215_s8 + $0x34] sm:$0xff]   ;;  %v2038_v0 = vld [vmem:[%s2215_s8 + $0x3c] sm:$0xff]   ;;  %v1298_v8 = vsel %vm492_vm0, %v1778_v62, 0 }
  0x32   : > { %v2034_v57 = vld [vmem:[%s2215_s8 + $0x2c] sm:$0xff]   ;;  %v2039_v1 = vld [vmem:[%s2215_s8 + $0x84] sm:$0xff]   ;;  %v2040_v3 = vld [vmem:[%s2215_s8 + $0xb4] sm:$0xff]  }
  0x33   : > { %v1795_v63 = vld [vmem:[%s2376_s1 + $0x10] sm:$0x3]  ;;  %v2041_v2 = vld [vmem:[%s2215_s8 + $0x4] sm:$0xff]   ;;  %v2042_v5 = vld [vmem:[%s2215_s8 + $0xbc] sm:$0xff]  }
  0x34   : > { %v2043_v4 = vld [vmem:[%s2215_s8 + $0xc] sm:$0xff]   ;;  %v1416_v6 = vsel %vm492_vm0, %v1795_v63, 0  ;;  %v2044_v7 = vld [vmem:[%s2215_s8 + $0xc4] sm:$0xff]   ;;  %v2045_v9 = vld [vmem:[%s2215_s8 + $0x14] sm:$0xff]  }
  0x35   : > { %v2047_v10 = vld [vmem:[%s2215_s8 + $0x1c] sm:$0xff]   ;;  %v2046_v11 = vld [vmem:[%s2215_s8 + $0xcc] sm:$0xff]   ;;  %v2049_v12 = vld [vmem:[%s2215_s8 + $0x94] sm:$0xff]  }
  0x36   : > { %1914 = vmatmul.mubr.msk.bf16.vlgmr.msra.gmra.mxu0 %vm479_vm1, %v2027_v44  ;;  %1904 = vmatmul.mubr.msk.bf16.vlgmr.msra.gmra.mxu1 %vm479_vm1, %v2026_v45  ;;  %v2048_v13 = vld [vmem:[%s2215_s8 + $0x4c] sm:$0xff]   ;;  %v2051_v14 = vld [vmem:[%s2215_s8 + $0x9c] sm:$0xff]   ;;  %v2050_v15 = vld [vmem:[%s2215_s8 + $0x54] sm:$0xff]  }
  0x37   : > { %1932 = vmatpush3.bf16.msra.mxu0 %v943_v46  ;;  %1922 = vmatpush3.bf16.msra.mxu1 %v824_v48  ;;  %v2053_v16 = vld [vmem:[%s2215_s8 + $0xa4] sm:$0xff]   ;;  %v2052_v17 = vld [vmem:[%s2215_s8 + $0x5c] sm:$0xff]   ;;  %v2055_v18 = vld [vmem:[%s2215_s8 + $0xac] sm:$0xff]  }
  0x38   : > { %1907 = vmatprep.mubr.msk.bf16.mxu1 %vm479_vm1, %v2028_v47  ;;  %1917 = vmatprep.mubr.msk.bf16.mxu0 %vm479_vm1, %v2029_v49  ;;  %v2054_v19 = vld [vmem:[%s2215_s8 + $0x64] sm:$0xff]  }
  0x39   : > { %1989 = vmatprep.subr.msk.bf16.mxu1 %vm492_vm0, %v1752_v50  ;;  %1990 = vmatprep.subr.msk.bf16.mxu0 %vm492_vm0, %v1761_v53 }
  0x3e   : > { %1918 = vmatmul.mubr.msk.bf16.gmra.mxu0 %vm479_vm1, %v2031_v52  ;;  %1908 = vmatmul.mubr.msk.bf16.gmra.mxu1 %vm479_vm1, %v2030_v51 }
  0x3f   : > { %1933 = vmatprep.mubr.msk.bf16.mxu0 %vm479_vm1, %v2033_v54  ;;  %1923 = vmatprep.mubr.msk.bf16.mxu1 %vm479_vm1, %v2032_v55 }
  0x46   : > { %1934 = vmatmul.mubr.msk.bf16.vlgmr.msra.gmra.mxu0 %vm479_vm1, %v2035_v56  ;;  %1924 = vmatmul.mubr.msk.bf16.vlgmr.msra.gmra.mxu1 %vm479_vm1, %v2034_v57 }
  0x47   : > { %1952 = vmatpush3.bf16.msra.mxu0 %v1180_v58  ;;  %1942 = vmatpush3.bf16.msra.mxu1 %v1062_v60 }
  0x48   : > { %1927 = vmatprep.mubr.msk.bf16.mxu1 %vm479_vm1, %v2036_v59  ;;  %1937 = vmatprep.mubr.msk.bf16.mxu0 %vm479_vm1, %v2037_v61 }
  0x49   : > { %1991 = vmatprep.subr.msk.bf16.mxu1 %vm492_vm0, %v1778_v62  ;;  %1992 = vmatprep.subr.msk.bf16.mxu0 %vm492_vm0, %v1795_v63 }
  0x4e   : > { %1938 = vmatmul.mubr.msk.bf16.gmra.mxu0 %vm479_vm1, %v2039_v1  ;;  %1928 = vmatmul.mubr.msk.bf16.gmra.mxu1 %vm479_vm1, %v2038_v0 }
  0x4f   : > { %1953 = vmatprep.mubr.msk.bf16.mxu0 %vm479_vm1, %v2041_v2  ;;  %1943 = vmatprep.mubr.msk.bf16.mxu1 %vm479_vm1, %v2040_v3 }
  0x56   : > { %1954 = vmatmul.mubr.msk.bf16.vlgmr.msra.gmra.mxu0 %vm479_vm1, %v2043_v4  ;;  %1944 = vmatmul.mubr.msk.bf16.vlgmr.msra.gmra.mxu1 %vm479_vm1, %v2042_v5 }
  0x57   : > { %1972 = vmatpush3.bf16.msra.mxu0 %v1416_v6  ;;  %1962 = vmatpush3.bf16.msra.mxu1 %v1298_v8 }
  0x58   : > { %1947 = vmatprep.mubr.msk.bf16.mxu1 %vm479_vm1, %v2044_v7  ;;  %1957 = vmatprep.mubr.msk.bf16.mxu0 %vm479_vm1, %v2045_v9 }
  0x5e   : > { %1958 = vmatmul.mubr.msk.bf16.gmra.mxu0 %vm479_vm1, %v2047_v10  ;;  %1948 = vmatmul.mubr.msk.bf16.gmra.mxu1 %vm479_vm1, %v2046_v11 }
  0x5f   : > { %1973 = vmatprep.mubr.msk.bf16.mxu0 %vm479_vm1, %v2049_v12  ;;  %1963 = vmatprep.mubr.msk.bf16.mxu1 %vm479_vm1, %v2048_v13 }
  0x66   : > { %1974 = vmatmul.mubr.msk.bf16.vlgmr.msra.gmra.mxu0 %vm479_vm1, %v2051_v14  ;;  %1964 = vmatmul.mubr.msk.bf16.vlgmr.msra.gmra.mxu1 %vm479_vm1, %v2050_v15 }
  0x67   : > { %1977 = vmatprep.mubr.msk.bf16.mxu0 %vm479_vm1, %v2053_v16  ;;  %1967 = vmatprep.mubr.msk.bf16.mxu1 %vm479_vm1, %v2052_v17 }
  0x6e   : > { %1978 = vmatmul.mubr.msk.bf16.gmra.mxu0 %vm479_vm1, %v2055_v18  ;;  %1968 = vmatmul.mubr.msk.bf16.gmra.mxu1 %vm479_vm1, %v2054_v19 }
  0xee   : > { %v1895_v20 = vpop.f32.mrf.mxu0  ;;  %v1899_v21 = vpop.f32.mrf.mxu1 }
  0xf0   : > { %v530_v22 = vpop.f32.mrf.mxu0  ;;  %v546_v23 = vpop.f32.mrf.mxu1 }
  0xf2   : > { %v1896_v24 = vpop.f32.mrf.mxu0  ;;  %v1900_v25 = vpop.f32.mrf.mxu1 }
  0xf4   : > { %v533_v26 = vpop.f32.mrf.mxu0  ;;  %v2321_v27 = vpop.f32.mrf.mxu1 }
  0xf6   : > { %v1915_v28 = vpop.f32.mrf.mxu0  ;;  %v1905_v29 = vpop.f32.mrf.mxu1 }
  0xf7   : > { %v639_v62 = vadd.f32 %v1905_v29, %v1895_v20 }
  0xf8   : > { %v741_v30 = vpop.f32.mrf.mxu0  ;;  %v630_v31 = vpop.f32.mrf.mxu1 }
  0xf9   : > { %v631_v63 = vadd.f32 %v630_v31, %v530_v22  ;;  %v774_v5 = vadd.f32 %v1915_v28, %v639_v62 }
  0xfa   : > { %v1916_v32 = vpop.f32.mrf.mxu0  ;;  %v1906_v33 = vpop.f32.mrf.mxu1 }
  0xfb   : > { %v642_v2 = vadd.f32 %v1906_v33, %v1896_v24  ;;  %v772_v6 = vadd.f32 %v741_v30, %v631_v63 }
  0xfc   : > { %v744_v34 = vpop.f32.mrf.mxu0  ;;  %v633_v35 = vpop.f32.mrf.mxu1 }
  0xfd   : > { %v634_v7 = vadd.f32 %v633_v35, %v533_v26  ;;  %v775_v10 = vadd.f32 %v1916_v32, %v642_v2 }
  0xfe   : > { %v1919_v36 = vpop.f32.mrf.mxu0  ;;  %v1909_v37 = vpop.f32.mrf.mxu1 }
  0xff   : > { %v655_v14 = vadd.f32 %v1909_v37, %v1899_v21  ;;  %v773_v16 = vadd.f32 %v744_v34, %v634_v7 }
 0x100   : > { %v757_v38 = vpop.f32.mrf.mxu0  ;;  %v646_v39 = vpop.f32.mrf.mxu1 }
 0x101   : > { %v647_v19 = vadd.f32 %v646_v39, %v546_v23  ;;  %v778_v30 = vadd.f32 %v1919_v36, %v655_v14 }
 0x102   : > { %v1920_v40 = vpop.f32.mrf.mxu0  ;;  %v1910_v41 = vpop.f32.mrf.mxu1 }
 0x103   : > { %v658_v20 = vadd.f32 %v1910_v41, %v1900_v25  ;;  %v776_v23 = vadd.f32 %v757_v38, %v647_v19 }
 0x104   : > { %v2323_v42 = vpop.f32.mrf.mxu0  ;;  %v649_v43 = vpop.f32.mrf.mxu1 }
 0x105   : > { %v650_v31 = vadd.f32 %v649_v43, %v2321_v27  ;;  %v779_v25 = vadd.f32 %v1920_v40, %v658_v20 }
 0x106   : > { %v1935_v44 = vpop.f32.mrf.mxu0  ;;  %v1925_v45 = vpop.f32.mrf.mxu1 }
 0x107   : > { %v893_v11 = vadd.f32 %v1925_v45, %v774_v5  ;;  %v777_v27 = vadd.f32 %v2323_v42, %v650_v31 }
 0x108   : > { %v979_v46 = vpop.f32.mrf.mxu0  ;;  %v860_v47 = vpop.f32.mrf.mxu1 }
 0x109   : > { %v891_v12 = vadd.f32 %v860_v47, %v772_v6  ;;  %v1012_v24 = vadd.f32 %v1935_v44, %v893_v11 }
 0x10a   : > { %v1936_v48 = vpop.f32.mrf.mxu0  ;;  %v1926_v49 = vpop.f32.mrf.mxu1 }
 0x10b   : > { %v894_v17 = vadd.f32 %v1926_v49, %v775_v10  ;;  %v1010_v28 = vadd.f32 %v979_v46, %v891_v12 }
 0x10c   : > { %v982_v50 = vpop.f32.mrf.mxu0  ;;  %v863_v51 = vpop.f32.mrf.mxu1 }
 0x10d   : > { %v892_v29 = vadd.f32 %v863_v51, %v773_v16  ;;  %v1013_v33 = vadd.f32 %v1936_v48, %v894_v17 }
 0x10e   : > { %v1939_v52 = vpop.f32.mrf.mxu0  ;;  %v1929_v53 = vpop.f32.mrf.mxu1 }
 0x10f   : > { %v897_v34 = vadd.f32 %v1929_v53, %v778_v30  ;;  %v1011_v41 = vadd.f32 %v982_v50, %v892_v29 }
 0x110   : > { %v2325_v54 = vpop.f32.mrf.mxu0  ;;  %v876_v55 = vpop.f32.mrf.mxu1 }
 0x111   : > { %v895_v43 = vadd.f32 %v876_v55, %v776_v23  ;;  %v1016_v38 = vadd.f32 %v1939_v52, %v897_v34 }
 0x112   : > { %v2327_v56 = vpop.f32.mrf.mxu0  ;;  %v1930_v57 = vpop.f32.mrf.mxu1 }
 0x113   : > { %v898_v45 = vadd.f32 %v1930_v57, %v779_v25  ;;  %v1014_v42 = vadd.f32 %v2325_v54, %v895_v43 }
 0x114   : > { %v2329_v58 = vpop.f32.mrf.mxu0  ;;  %v879_v59 = vpop.f32.mrf.mxu1 }
 0x115   : > { %v896_v40 = vadd.f32 %v879_v59, %v777_v27  ;;  %v1017_v55 = vadd.f32 %v2327_v56, %v898_v45 }
 0x116   : > { %v1955_v60 = vpop.f32.mrf.mxu0  ;;  %v1945_v61 = vpop.f32.mrf.mxu1 }
 0x117   : > { %v1131_v35 = vadd.f32 %v1945_v61, %v1012_v24 }
 0x118   : > { %v1216_v0 = vpop.f32.mrf.mxu0  ;;  %v1098_v1 = vpop.f32.mrf.mxu1 }
 0x119   : > { %v1129_v21 = vadd.f32 %v1098_v1, %v1010_v28  ;;  %v1249_v47 = vadd.f32 %v1955_v60, %v1131_v35 }
 0x11a   : > { %v1956_v3 = vpop.f32.mrf.mxu0  ;;  %v1946_v4 = vpop.f32.mrf.mxu1 }
 0x11b   : > { %v1132_v36 = vadd.f32 %v1946_v4, %v1013_v33  ;;  %v1247_v48 = vadd.f32 %v1216_v0, %v1129_v21  ;;  %v1015_v4 = vadd.f32 %v2329_v58, %v896_v40 }
 0x11c   : > { %v1219_v8 = vpop.f32.mrf.mxu0  ;;  %v1101_v9 = vpop.f32.mrf.mxu1 }
 0x11d   : > { %v1130_v49 = vadd.f32 %v1101_v9, %v1011_v41  ;;  %v1250_v50 = vadd.f32 %v1956_v3, %v1132_v36 }
 0x11e   : > { %v1959_v13 = vpop.f32.mrf.mxu0  ;;  %v1949_v15 = vpop.f32.mrf.mxu1 }
 0x11f   : > { %v1135_v57 = vadd.f32 %v1949_v15, %v1016_v38  ;;  %v1248_v0 = vadd.f32 %v1219_v8, %v1130_v49 }
 0x120   : > { %v2331_v18 = vpop.f32.mrf.mxu0  ;;  %v1114_v22 = vpop.f32.mrf.mxu1 }
 0x121   : > { %v1133_v5 = vadd.f32 %v1114_v22, %v1014_v42  ;;  %v1253_v11 = vadd.f32 %v1959_v13, %v1135_v57 }
 0x122   : > { %v1960_v26 = vpop.f32.mrf.mxu0  ;;  %v1950_v32 = vpop.f32.mrf.mxu1 }
 0x123   : > { %v1136_v52 = vadd.f32 %v1950_v32, %v1017_v55  ;;  %v1251_v14 = vadd.f32 %v2331_v18, %v1133_v5 }
 0x124   : > { %v1235_v37 = vpop.f32.mrf.mxu0  ;;  %v1117_v39 = vpop.f32.mrf.mxu1 }
 0x125   : > { %v1134_v54 = vadd.f32 %v1117_v39, %v1015_v4  ;;  %v1254_v15 = vadd.f32 %v1960_v26, %v1136_v52 }
 0x126   : > { %v1975_v44 = vpop.f32.mrf.mxu0  ;;  %v1965_v46 = vpop.f32.mrf.mxu1 }
 0x127   : > { %v1367_v61 = vadd.f32 %v1965_v46, %v1249_v47  ;;  %v1252_v24 = vadd.f32 %v1235_v37, %v1134_v54 }
 0x128   : > { %v1452_v51 = vpop.f32.mrf.mxu0  ;;  %v1334_v53 = vpop.f32.mrf.mxu1 }
 0x129   : > { %v1365_v62 = vadd.f32 %v1334_v53, %v1247_v48  ;;  %v1485_v6 = vadd.f32 %v1975_v44, %v1367_v61 }
 0x12a   : > { %v1976_v63 = vpop.f32.mrf.mxu0  ;;  %v1966_v60 = vpop.f32.mrf.mxu1 }
 0x12b   : > { %v1368_v1 = vadd.f32 %v1966_v60, %v1250_v50  ;;  %v1483_v3 = vadd.f32 %v1452_v51, %v1365_v62  ;;  %v1507_v30 = vmul.f32 %v1485_v6, %v1485_v6 }
 0x12c   : > { %v1455_v2 = vpop.f32.mrf.mxu0  ;;  %v1337_v59 = vpop.f32.mrf.mxu1 }
 0x12d   : > { %v1486_v7 = vadd.f32 %v1976_v63, %v1368_v1  ;;  %v1366_v9 = vadd.f32 %v1337_v59, %v1248_v0  ;;  %v1505_v19 = vmul.f32 %v1483_v3, %v1483_v3 }
 0x12e   : > { %v1979_v10 = vpop.f32.mrf.mxu0  ;;  %v1969_v56 = vpop.f32.mrf.mxu1 }
 0x12f   : > { %v1831_v8 = vpack.c.bf16 %v1486_v7, %v1485_v6  ;;  %v1484_v12 = vadd.f32 %v1455_v2, %v1366_v9  ;;  %v1371_v16 = vadd.f32 %v1969_v56, %v1253_v11  ;;  %v1508_v21 = vmul.f32 %v1486_v7, %v1486_v7 }
 0x130   : > { %v1468_v58 = vpop.f32.mrf.mxu0  ;;  %v1350_v17 = vpop.f32.mrf.mxu1 }
 0x131   : > { %1843 = vst [vmem:[%s2354_s29 + $0x8] sm:$0xff] %v1831_v8   ;;  %v1491_v13 = vadd.f32 %v1484_v12, %v1483_v3  ;;  %v1506_v20 = vmul.f32 %v1484_v12, %v1484_v12  ;;  %v1826_v22 = vpack.c.bf16 %v1484_v12, %v1483_v3  ;;  %v1369_v28 = vadd.f32 %v1350_v17, %v1251_v14 }
 0x132   : > { %v1970_v29 = vpop.f32.mrf.mxu1  ;;  %v1980_v35 = vpop.f32.mrf.mxu0  ;;  %v1489_v18 = vadd.f32 %v1979_v10, %v1371_v16 }
 0x133   : > { %v1492_v31 = vadd.f32 %v1491_v13, %v1485_v6  ;;  %v1513_v32 = vadd.f32 %v1506_v20, %v1505_v19  ;;  %1827 = vst [vmem:[%s2354_s29] sm:$0xff] %v1826_v22   ;;  %v1372_v33 = vadd.f32 %v1970_v29, %v1254_v15  ;;  %v1487_v26 = vadd.f32 %v1468_v58, %v1369_v28 }
 0x134   : > { %v1353_v23 = vpop.f32.mrf.mxu1  ;;  %v1471_v43 = vpop.f32.mrf.mxu0  ;;  %v1511_v51 = vmul.f32 %v1489_v18, %v1489_v18 }
 0x135   : > { %v1514_v25 = vadd.f32 %v1513_v32, %v1507_v30  ;;  %v1493_v34 = vadd.f32 %v1492_v31, %v1486_v7  ;;  %v1490_v39 = vadd.f32 %v1980_v35, %v1372_v33  ;;  %v1370_v41 = vadd.f32 %v1353_v23, %v1252_v24 }
 0x136   : > { %v1509_v37 = vmul.f32 %v1487_v26, %v1487_v26 }
 0x137   : > { %v1494_v36 = vadd.f32 %v1493_v34, %v1487_v26  ;;  %v1515_v44 = vadd.f32 %v1514_v25, %v1508_v21  ;;  %v1841_v27 = vpack.c.bf16 %v1490_v39, %v1489_v18  ;;  %v1488_v45 = vadd.f32 %v1471_v43, %v1370_v41 }
 0x138   : > { %v1512_v53 = vmul.f32 %v1490_v39, %v1490_v39 }
 0x139   : > { %v1516_v46 = vadd.f32 %v1515_v44, %v1509_v37  ;;  %1845 = vst [vmem:[%s2354_s29 + $0x18] sm:$0xff] %v1841_v27   ;;  %v1495_v47 = vadd.f32 %v1494_v36, %v1488_v45  ;;  %v1510_v48 = vmul.f32 %v1488_v45, %v1488_v45  ;;  %v1836_v49 = vpack.c.bf16 %v1488_v45, %v1487_v26 }
 0x13b   : > { %v1496_v38 = vadd.f32 %v1495_v47, %v1489_v18  ;;  %v1517_v40 = vadd.f32 %v1516_v46, %v1510_v48  ;;  %1844 = vst [vmem:[%s2354_s29 + $0x10] sm:$0xff] %v1836_v49  }
 0x13d   : > { %v1497_v50 = vadd.f32 %v1496_v38, %v1490_v39  ;;  %v1518_v61 = vadd.f32 %v1517_v40, %v1511_v51 }
 0x13f   : > { %v1498_v62 = vrot.slane %v1497_v50, 4  ;;  %v1519_v63 = vadd.f32 %v1518_v61, %v1512_v53 }
 0x141   : > { %v1499_v42 = vadd.f32 %v1498_v62, %v1497_v50  ;;  %v1520_v55 = vrot.slane %v1519_v63, 4 }
 0x143   : > { %v1500_v57 = vrot.slane %v1499_v42, 2  ;;  %v1521_v60 = vadd.f32 %v1520_v55, %v1519_v63 }
 0x145   : > { %v1501_v0 = vadd.f32 %v1500_v57, %v1499_v42  ;;  %v1522_v1 = vrot.slane %v1521_v60, 2 }
 0x147   : > { %v1502_v2 = vrot.slane %v1501_v0, 1  ;;  %v1523_v4 = vadd.f32 %v1522_v1, %v1521_v60 }
 0x149   : > { %v1503_v5 = vadd.f32 %v1502_v2, %v1501_v0  ;;  %v1524_v52 = vrot.slane %v1523_v4, 1 }
 0x14b   : > { %1504 = vst [vmem:[%s437_s6] sm:$0x1] %v1503_v5  ;;  %v1525_v59 = vadd.f32 %v1524_v52, %v1523_v4 }
 0x14d   : > { %1526 = vst [vmem:[%s437_s6 + $0x1] sm:$0x1] %v1525_v59 }
 0x14e PF: > { %p11_p9 = scmp.ge.s32.totalorder %s2117_s16, 4   ;;  %s2380_s12 = smov %s2074_s13 }
 0x14f   : > { %s2381_s13 = smov %s2126_s19  ;;  %s2382_s14 = smov %s2117_s16 }
 0x150   :  { %13 = sbr.rel (!%p11_p9) target bundleno = 2 (0x2), region = 129 }

// kernel: basic_block_forward.7
= control target key start
LH: loop header
LB: loop body
LE: loop exit
PB: predicated region body
PF: predicated region fallthrough
CT: control target
= control target key end

     0   :  { %s576_s12 = smov 0   ;;  %s603_s0 = inlined_call_operand.vmem [shape: bf16[1,2,64,4], index: 0, kind: input, shape index: {}]   ;;  %s604_s1 = inlined_call_operand.vmem [shape: bf16[1,4,128], index: 1, kind: input, shape index: {}]   ;;  %s605_s2 = inlined_call_operand.vmem [shape: bf16[2,64,128], index: 2, kind: output, shape index: {0}]   ;;  %s606_s3 = inlined_call_operand.vmem [shape: f32[2,2,128], index: 3, kind: output, shape index: {1}]  }
   0x1 LB: > { %s456_s13 = sadd.s32 4294967295, %s554_s12   ;;  %p460_p0 = scmp.ge.s32.totalorder %s554_s12, 1  ;;  %s554_s12 = sphi %s576_s12, %s14_s12  }
   0x2   : > { %p140_p1 = scmp.lt.s32.totalorder %s554_s12, 3 }
   0x4   : > { %p141_p2 = pnand %p460_p0, %p140_p1 }
   0x5   : > { %p168_p3 = scmp.lt.s32.totalorder (!%p141_p2), %s456_s13, 1 }
   0x6   : > { %144 = sbr.rel (%p141_p2) target bundleno = 244 (0xf4), region = 28 }
   0xb   : > { %v191_v0 = vld [vmem:[%s604_s1] sm:$0x3]  ;;  %vm225_vm0 = vcmask 1041408   ;;  %s608_s13 = smov (!%p168_p3, %s456_s13), 1  ;;  %vm212_vm1 = vcmask 31744  }
   0xc   : > { %534 = vmatprep.subr.msk.bf16.mxu0 %vm225_vm0, %v191_v0  ;;  %v227_v1 = vsel %vm225_vm0, %v191_v0, 0  ;;  %535 = vmatprep.subr.msk.bf16.mxu1 %vm225_vm0, %v191_v0  ;;  %s484_s16 = sshll.u32 %s608_s13, 5  ;;  %s465_s23 = sshll.u32 %s608_s13, 1 }
   0xd   : > { %523 = vmatpush3.bf16.msra.mxu0 %v227_v1  ;;  %533 = vmatpush3.bf16.msra.mxu1 %v227_v1  ;;  %s172_s19 = scalar_lea.vmem %s603_s0, %s484_s16  ;;  %s177_s22 = scalar_lea.vmem %s605_s2, %s484_s16 }
   0xe   : > { %v544_v2 = vld [vmem:[%s172_s19] sm:$0xff]   ;;  %v545_v3 = vld [vmem:[%s172_s19 + $0x8] sm:$0xff]   ;;  %v546_v4 = vld [vmem:[%s172_s19 + $0x10] sm:$0xff]   ;;  %s181_s26 = scalar_lea.vmem %s606_s3, %s465_s23 }
   0xf   : > { %524 = vmatprep.mubr.msk.bf16.mxu0 %vm212_vm1, %v544_v2  ;;  %v547_v5 = vld [vmem:[%s172_s19 + $0x18] sm:$0xff]   ;;  %528 = vmatprep.mubr.msk.bf16.mxu1 %vm212_vm1, %v546_v4 }
  0x10   : > { %525 = vmatmul.mubr.msk.bf16.vlgmr.msra.gmra.mxu0 %vm212_vm1, %v545_v3  ;;  %529 = vmatmul.mubr.msk.bf16.vlgmr.msra.gmra.mxu1 %vm212_vm1, %v547_v5 }
  0xd0   : > { %v526_v6 = vpop.f32.mrf.mxu0  ;;  %v530_v8 = vpop.f32.mrf.mxu1 }
  0xd1   : > { %v310_v20 = vmul.f32 %v526_v6, %v526_v6  ;;  %v314_v33 = vmul.f32 %v530_v8, %v530_v8 }
  0xd2   : > { %v263_v7 = vpop.f32.mrf.mxu0  ;;  %v279_v10 = vpop.f32.mrf.mxu1 }
  0xd3   : > { %v308_v14 = vmul.f32 %v263_v7, %v263_v7  ;;  %v312_v27 = vmul.f32 %v279_v10, %v279_v10 }
  0xd4   : > { %v527_v9 = vpop.f32.mrf.mxu0  ;;  %v531_v13 = vpop.f32.mrf.mxu1 }
  0xd5   : > { %v502_v11 = vpack.c.bf16 %v527_v9, %v526_v6  ;;  %v512_v18 = vpack.c.bf16 %v531_v13, %v530_v8  ;;  %v311_v24 = vmul.f32 %v527_v9, %v527_v9  ;;  %v315_v36 = vmul.f32 %v531_v13, %v531_v13 }
  0xd6   : > { %v266_v12 = vpop.f32.mrf.mxu0  ;;  %v282_v19 = vpop.f32.mrf.mxu1 }
  0xd7   : > { %514 = vst [vmem:[%s177_s22 + $0x8] sm:$0xff] %v502_v11   ;;  %v294_v15 = vadd.f32 %v266_v12, %v263_v7  ;;  %v309_v16 = vmul.f32 %v266_v12, %v266_v12  ;;  %v497_v17 = vpack.c.bf16 %v266_v12, %v263_v7  ;;  %v507_v23 = vpack.c.bf16 %v282_v19, %v279_v10 }
  0xd8   : > { %516 = vst [vmem:[%s177_s22 + $0x18] sm:$0xff] %v512_v18   ;;  %v313_v31 = vmul.f32 %v282_v19, %v282_v19 }
  0xd9   : > { %v295_v21 = vadd.f32 %v526_v6, %v294_v15  ;;  %v316_v22 = vadd.f32 %v309_v16, %v308_v14  ;;  %498 = vst [vmem:[%s177_s22] sm:$0xff] %v497_v17   ;;  %515 = vst [vmem:[%s177_s22 + $0x10] sm:$0xff] %v507_v23  }
  0xdb   : > { %v317_v25 = vadd.f32 %v316_v22, %v310_v20  ;;  %v296_v26 = vadd.f32 %v527_v9, %v295_v21 }
  0xdd   : > { %v297_v28 = vadd.f32 %v296_v26, %v279_v10  ;;  %v318_v29 = vadd.f32 %v317_v25, %v311_v24 }
  0xdf   : > { %v298_v30 = vadd.f32 %v297_v28, %v282_v19  ;;  %v319_v32 = vadd.f32 %v318_v29, %v312_v27 }
  0xe1   : > { %v299_v34 = vadd.f32 %v530_v8, %v298_v30  ;;  %v320_v35 = vadd.f32 %v319_v32, %v313_v31 }
  0xe3   : > { %v300_v37 = vadd.f32 %v531_v13, %v299_v34  ;;  %v321_v38 = vadd.f32 %v320_v35, %v314_v33 }
  0xe5   : > { %v301_v39 = vrot.slane %v300_v37, 4  ;;  %v322_v40 = vadd.f32 %v321_v38, %v315_v36 }
  0xe7   : > { %v302_v41 = vadd.f32 %v301_v39, %v300_v37  ;;  %v323_v42 = vrot.slane %v322_v40, 4 }
  0xe9   : > { %v303_v43 = vrot.slane %v302_v41, 2  ;;  %v324_v44 = vadd.f32 %v323_v42, %v322_v40 }
  0xeb   : > { %v304_v45 = vadd.f32 %v303_v43, %v302_v41  ;;  %v325_v46 = vrot.slane %v324_v44, 2 }
  0xed   : > { %v305_v47 = vrot.slane %v304_v45, 1  ;;  %v326_v48 = vadd.f32 %v325_v46, %v324_v44 }
  0xef   : > { %v306_v49 = vadd.f32 %v305_v47, %v304_v45  ;;  %v327_v50 = vrot.slane %v326_v48, 1 }
  0xf1   : > { %307 = vst [vmem:[%s181_s26] sm:$0x1] %v306_v49  ;;  %v328_v51 = vadd.f32 %v327_v50, %v326_v48 }
  0xf3   : > { %329 = vst [vmem:[%s181_s26 + $0x1] sm:$0x1] %v328_v51 }
  0xf4 PF: > { %s14_s12 = sadd.s32 1, %s554_s12  }
  0xf5   : > { %p11_p4 = scmp.ge.s32.totalorder %s14_s12, 4  }
  0xf7   :  { %13 = sbr.rel (!%p11_p4) target bundleno = 1 (0x1), region = 70 }

// kernel: basic_block_forward.9
= control target key start
LH: loop header
LB: loop body
LE: loop exit
PB: predicated region body
PF: predicated region fallthrough
CT: control target
= control target key end

     0   :  { %s638_s21 = smov 0   ;;  %s687_s0 = inlined_call_operand.vmem [shape: bf16[128,128], index: 0, kind: input, shape index: {}]   ;;  %s688_s1 = inlined_call_operand.vmem [shape: bf16[128,128], index: 1, kind: input, shape index: {}]   ;;  %s689_s2 = inlined_call_operand.vmem [shape: f32[1,128], index: 2, kind: input, shape index: {}]   ;;  %s690_s3 = inlined_call_operand.vmem [shape: f32[1,128], index: 3, kind: input, shape index: {}]   ;;  %s691_s4 = inlined_call_operand.vmem [shape: f32[1,128], index: 4, kind: input, shape index: {}]   ;;  %s692_s5 = inlined_call_operand.vmem [shape: f32[1,128], index: 5, kind: input, shape index: {}]   ;;  %s693_s6 = inlined_call_operand.vmem [shape: bf16[128,128], index: 6, kind: output, shape index: {}]  }
   0x1 LB: > { %s493_s22 = sadd.s32 4294967295, %s601_s21   ;;  %p497_p0 = scmp.ge.s32.totalorder %s601_s21, 1  ;;  %s601_s21 = sphi %s638_s21, %s16_s21  }
   0x2   : > { %p224_p1 = scmp.lt.s32.totalorder %s601_s21, 3 }
   0x4   : > { %p225_p2 = pnand %p497_p0, %p224_p1 }
   0x5   : > { %s498_s23 = sshll.u32 (!%p225_p2), %s493_s22, 3 }
   0x6   : > { %228 = sbr.rel (%p225_p2) target bundleno = 40 (0x28), region = 44  ;;  %p260_p3 = scmp.lt.s32.totalorder (!%p225_p2), %s498_s23, 15 }
   0xb   : > { %s695_s23 = smov (!%p260_p3, %s498_s23), 15  ;;  %v504_v2 = vld [vmem:[%s689_s2] ss:$0 sm:$0xff] }
   0xc   : > { %s646_s24 = sshll.u32 %s695_s23, 2  ;;  %v506_v6 = vld [vmem:[%s691_s4] ss:$0 sm:$0xff] }
   0xd   : > { %s652_s27 = scalar_lea.vmem %s687_s0, %s646_s24  ;;  %s658_s30 = scalar_lea.vmem %s688_s1, %s646_s24  ;;  %v505_v12 = vld [vmem:[%s690_s3] ss:$0 sm:$0xff] }
   0xe   : > { %v527_v0 = vld [vmem:[%s652_s27] sm:$0xff]   ;;  %v578_v1 = vld [vmem:[%s652_s27 + $0x8] sm:$0xff]   ;;  %v579_v15 = vld [vmem:[%s652_s27 + $0x10] sm:$0xff]   ;;  %s275_s17 = scalar_lea.vmem %s693_s6, %s646_s24 }
   0xf   : > { %v528_v3 = vunpack.c.l.bf16 %v527_v0  ;;  %v529_v4 = vunpack.c.h.bf16 %v527_v0  ;;  %v543_v5 = vld [vmem:[%s658_s30] sm:$0xff]   ;;  %v532_v7 = vunpack.c.l.bf16 %v578_v1  ;;  %v533_v8 = vunpack.c.h.bf16 %v578_v1  ;;  %v581_v9 = vld [vmem:[%s658_s30 + $0x8] sm:$0xff]   ;;  %v582_v20 = vld [vmem:[%s658_s30 + $0x10] sm:$0xff]  }
  0x10   : > { %v544_v10 = vunpack.c.l.bf16 %v543_v5  ;;  %v545_v11 = vunpack.c.h.bf16 %v543_v5  ;;  %v548_v13 = vunpack.c.l.bf16 %v581_v9  ;;  %v549_v14 = vunpack.c.h.bf16 %v581_v9  ;;  %v507_v29 = vld [vmem:[%s692_s5] ss:$0 sm:$0xff]  ;;  %v580_v34 = vld [vmem:[%s652_s27 + $0x18] sm:$0xff]  }
  0x11   : > { %v316_v16 = vmul.f32 %v528_v3, %v504_v2  ;;  %v317_v17 = vmul.f32 %v529_v4, %v504_v2  ;;  %v318_v18 = vmul.f32 %v532_v7, %v504_v2  ;;  %v319_v19 = vmul.f32 %v533_v8, %v504_v2  ;;  %v583_v47 = vld [vmem:[%s658_s30 + $0x18] sm:$0xff]  }
  0x12   : > { %v346_v21 = vmul.f32 %v544_v10, %v506_v6  ;;  %v347_v22 = vmul.f32 %v545_v11, %v506_v6  ;;  %v348_v23 = vmul.f32 %v548_v13, %v506_v6  ;;  %v349_v24 = vmul.f32 %v549_v14, %v506_v6 }
  0x13   : > { %v331_v25 = vadd.f32 %v505_v12, %v316_v16  ;;  %v332_v26 = vadd.f32 %v505_v12, %v317_v17  ;;  %v333_v27 = vadd.f32 %v505_v12, %v318_v18  ;;  %v334_v28 = vadd.f32 %v505_v12, %v319_v19 }
  0x14   : > { %v536_v30 = vunpack.c.l.bf16 %v579_v15  ;;  %v537_v31 = vunpack.c.h.bf16 %v579_v15  ;;  %v552_v32 = vunpack.c.l.bf16 %v582_v20  ;;  %v553_v33 = vunpack.c.h.bf16 %v582_v20 }
  0x15   : > { %v354_v35 = vadd.f32 %v346_v21, %v331_v25  ;;  %v355_v36 = vadd.f32 %v347_v22, %v332_v26  ;;  %v356_v37 = vadd.f32 %v348_v23, %v333_v27  ;;  %v357_v38 = vadd.f32 %v349_v24, %v334_v28 }
  0x16   : > { %v320_v39 = vmul.f32 %v536_v30, %v504_v2  ;;  %v321_v40 = vmul.f32 %v537_v31, %v504_v2  ;;  %v350_v41 = vmul.f32 %v552_v32, %v506_v6  ;;  %v351_v42 = vmul.f32 %v553_v33, %v506_v6 }
  0x17   : > { %v369_v43 = vadd.f32 %v507_v29, %v354_v35  ;;  %v370_v44 = vadd.f32 %v507_v29, %v355_v36  ;;  %v371_v45 = vadd.f32 %v507_v29, %v356_v37  ;;  %v372_v46 = vadd.f32 %v507_v29, %v357_v38 }
  0x18   : > { %v335_v48 = vadd.f32 %v505_v12, %v320_v39  ;;  %v336_v49 = vadd.f32 %v505_v12, %v321_v40  ;;  %v540_v50 = vunpack.c.l.bf16 %v580_v34  ;;  %v541_v51 = vunpack.c.h.bf16 %v580_v34 }
  0x19   : > { %v377_v52 = vmax.f32 %v369_v43, 0.0  ;;  %v378_v53 = vmax.f32 %v370_v44, 0.0  ;;  %v379_v54 = vmax.f32 %v371_v45, 0.0  ;;  %v380_v55 = vmax.f32 %v372_v46, 0.0 }
  0x1a   : > { %v358_v56 = vadd.f32 %v350_v41, %v335_v48  ;;  %v359_v57 = vadd.f32 %v351_v42, %v336_v49  ;;  %v556_v58 = vunpack.c.l.bf16 %v583_v47  ;;  %v557_v59 = vunpack.c.h.bf16 %v583_v47 }
  0x1b   : > { %v561_v60 = vpack.c.bf16 %v378_v53, %v377_v52  ;;  %v566_v61 = vpack.c.bf16 %v380_v55, %v379_v54  ;;  %v322_v62 = vmul.f32 %v540_v50, %v504_v2  ;;  %v323_v63 = vmul.f32 %v541_v51, %v504_v2 }
  0x1c   : > { %v373_v0 = vadd.f32 %v507_v29, %v358_v56  ;;  %v374_v1 = vadd.f32 %v507_v29, %v359_v57  ;;  %v352_v3 = vmul.f32 %v556_v58, %v506_v6  ;;  %v353_v4 = vmul.f32 %v557_v59, %v506_v6 }
  0x1d   : > { %562 = vst [vmem:[%s275_s17] sm:$0xff] %v561_v60   ;;  %584 = vst [vmem:[%s275_s17 + $0x8] sm:$0xff] %v566_v61   ;;  %v337_v5 = vadd.f32 %v505_v12, %v322_v62  ;;  %v338_v7 = vadd.f32 %v505_v12, %v323_v63 }
  0x1e   : > { %v381_v8 = vmax.f32 %v373_v0, 0.0  ;;  %v382_v9 = vmax.f32 %v374_v1, 0.0 }
  0x1f   : > { %v360_v10 = vadd.f32 %v352_v3, %v337_v5  ;;  %v361_v11 = vadd.f32 %v353_v4, %v338_v7 }
  0x20   : > { %v571_v13 = vpack.c.bf16 %v382_v9, %v381_v8 }
  0x21   : > { %v375_v14 = vadd.f32 %v507_v29, %v360_v10  ;;  %v376_v15 = vadd.f32 %v507_v29, %v361_v11 }
  0x22   : > { %585 = vst [vmem:[%s275_s17 + $0x10] sm:$0xff] %v571_v13  }
  0x23   : > { %v383_v16 = vmax.f32 %v375_v14, 0.0  ;;  %v384_v17 = vmax.f32 %v376_v15, 0.0 }
  0x25   : > { %v576_v18 = vpack.c.bf16 %v384_v17, %v383_v16 }
  0x27   : > { %586 = vst [vmem:[%s275_s17 + $0x18] sm:$0xff] %v576_v18  }
  0x28 PF: > { %s16_s21 = sadd.s32 1, %s601_s21  }
  0x29   : > { %p13_p4 = scmp.ge.s32.totalorder %s16_s21, 4  }
  0x2b   :  { %15 = sbr.rel (!%p13_p4) target bundleno = 1 (0x1), region = 77 }

// kernel: basic_block_forward.8
= control target key start
LH: loop header
LB: loop body
LE: loop exit
PB: predicated region body
PF: predicated region fallthrough
CT: control target
= control target key end

     0   :  { %s1993_s12 = smov 0   ;;  %s1995_s13 = smov 0   ;;  %s2204_s0 = inlined_call_operand.vmem [shape: bf16[3,2,80,8], index: 0, kind: input, shape index: {}]   ;;  %s2205_s1 = inlined_call_operand.vmem [shape: bf16[9,8,128], index: 1, kind: input, shape index: {}]   ;;  %s2206_s2 = inlined_call_operand.vmem [shape: bf16[2,64,128], index: 2, kind: output, shape index: {0}]   ;;  %s2207_s3 = inlined_call_operand.vmem [shape: f32[2,2,128], index: 3, kind: output, shape index: {1}]  }
   0x1   :  { %s1997_s14 = smov 0  }
   0x2 LB: > { %s1560_s15 = sadd.s32 4294967295, %s1971_s14   ;;  %s2010_s16 = sadd.s32 1, %s1971_s14   ;;  %s1971_s14 = sphi %s1997_s14, %s2211_s14   ;;  %s1967_s13 = sphi %s1995_s13, %s2210_s13   ;;  %s1963_s12 = sphi %s1993_s12, %s2209_s12  }
   0x3   : > { %s18_s17 = ssub.s32 %s1971_s14, %s2010_s16  ;;  %s21_s18 = sadd.s32 1, %s1967_s13 }
   0x4   : > { %p19_p0 = scmp.eq.s32.totalorder %s18_s17, 0  ;;  %p28_p1 = scmp.ne.s32.totalorder %s1967_s13, %s1963_s12 }
   0x5   : > { %p29_p2 = scmp.eq.s32.totalorder %s1971_s14, 0  ;;  %p1563_p4 = scmp.ge.s32.totalorder %s1971_s14, 2 }
   0x6   : > { %s2019_s19 = scalar_select %p19_p0, %s1967_s13, %s21_s18  }
   0x7   : > { %p30_p3 = por %p29_p2, %p28_p1  ;;  %130 = sbr.rel (%p1563_p4) target bundleno = 25 (0x19), region = 20 }
   0xc   : > { %133 = sbr.rel (!%p30_p3) target bundleno = 25 (0x19), region = 24  ;;  %s135_s20 = sand.u32 (%p30_p3), 1, %s1967_s13  }
   0xd   : > { %s1887_s21 = smul.u32 (%p30_p3), 40, %s1971_s14 }
   0xe   : > { %s1886_s22 = smul.u32 (%p30_p3), 120, %s135_s20 }
   0xf   : > { %s140_s25 = scalar_lea.vmem (%p30_p3), %s2204_s0, %s1887_s21 }
  0x10   : > { %v157_v0 = vld [vmem:[%s140_s25] sm:$0xff] (%p30_p3)   ;;  %v161_v1 = vld [vmem:[%s140_s25 + $0x8] sm:$0xff] (%p30_p3)   ;;  %v165_v2 = vld [vmem:[%s140_s25 + $0x10] sm:$0xff] (%p30_p3)   ;;  %s137_s26 = scalar_lea.vmem (%p30_p3), [#allocation2], %s1886_s22 }
  0x11   : > { %158 = vst [vmem:[%s137_s26] sm:$0xff] %v157_v0   ;;  %162 = vst [vmem:[%s137_s26 + $0x8] sm:$0xff] %v161_v1   ;;  %v169_v3 = vld [vmem:[%s140_s25 + $0x18] sm:$0xff]   ;;  %v173_v4 = vld [vmem:[%s140_s25 + $0x20] sm:$0xff]  }
  0x12   : > { %166 = vst [vmem:[%s137_s26 + $0x10] sm:$0xff] %v165_v2   ;;  %v177_v5 = vld [vmem:[%s140_s25 + $0x50] sm:$0xff]   ;;  %170 = vst [vmem:[%s137_s26 + $0x18] sm:$0xff] %v169_v3   ;;  %v181_v6 = vld [vmem:[%s140_s25 + $0x58] sm:$0xff]  }
  0x13   : > { %174 = vst [vmem:[%s137_s26 + $0x20] sm:$0xff] %v173_v4   ;;  %178 = vst [vmem:[%s137_s26 + $0x28] sm:$0xff] %v177_v5   ;;  %v185_v7 = vld [vmem:[%s140_s25 + $0x60] sm:$0xff]   ;;  %v189_v8 = vld [vmem:[%s140_s25 + $0x68] sm:$0xff]  }
  0x14   : > { %182 = vst [vmem:[%s137_s26 + $0x30] sm:$0xff] %v181_v6   ;;  %186 = vst [vmem:[%s137_s26 + $0x38] sm:$0xff] %v185_v7   ;;  %v193_v9 = vld [vmem:[%s140_s25 + $0x70] sm:$0xff]   ;;  %v197_v10 = vld [vmem:[%s140_s25 + $0xa0] sm:$0xff]  }
  0x15   : > { %190 = vst [vmem:[%s137_s26 + $0x40] sm:$0xff] %v189_v8   ;;  %v201_v11 = vld [vmem:[%s140_s25 + $0xa8] sm:$0xff]   ;;  %194 = vst [vmem:[%s137_s26 + $0x48] sm:$0xff] %v193_v9   ;;  %v205_v12 = vld [vmem:[%s140_s25 + $0xb0] sm:$0xff]  }
  0x16   : > { %198 = vst [vmem:[%s137_s26 + $0x50] sm:$0xff] %v197_v10   ;;  %202 = vst [vmem:[%s137_s26 + $0x58] sm:$0xff] %v201_v11   ;;  %v209_v13 = vld [vmem:[%s140_s25 + $0xb8] sm:$0xff]   ;;  %v213_v14 = vld [vmem:[%s140_s25 + $0xc0] sm:$0xff]  }
  0x17   : > { %206 = vst [vmem:[%s137_s26 + $0x60] sm:$0xff] %v205_v12   ;;  %210 = vst [vmem:[%s137_s26 + $0x68] sm:$0xff] %v209_v13  }
  0x18   : > { %214 = vst [vmem:[%s137_s26 + $0x70] sm:$0xff] %v213_v14  }
  0x19 PF: > { %p1565_p5 = scmp.ge.s32.totalorder %s1971_s14, 1  ;;  %p299_p6 = scmp.lt.s32.totalorder %s1971_s14, 3 }
  0x1b   : > { %p300_p7 = pnand %p1565_p5, %p299_p6 }
  0x1c   : > { %s306_s29 = sand.u32 (!%p300_p7), 1, %s1963_s12   ;;  %p2165_p8 = scmp.lt.s32.totalorder (!%p300_p7), %s1560_s15, 1 }
  0x1d   : > { %303 = sbr.rel (%p300_p7) target bundleno = 327 (0x147), region = 65 }
  0x1e   : > { %s1888_s30 = smul.u32 (!%p300_p7), 120, %s306_s29 }
  0x20   : > { %s2044_s8 = scalar_lea.vmem (!%p300_p7), [#allocation2], %s1888_s30 }
  0x22   : > { %v1577_v15 = vld [vmem:[%s2205_s1 + $0x4] sm:$0xf]  ;;  %vm396_vm0 = vcmask 1043456   ;;  %v351_v17 = vld [vmem:[%s2205_s1] sm:$0xf]  ;;  %vm383_vm1 = vcmask 64512  }
  0x23   : > { %1877 = vmatprep.subr.msk.bf16.mxu1 %vm396_vm0, %v1577_v15  ;;  %1876 = vmatprep.subr.msk.bf16.mxu0 %vm396_vm0, %v1577_v15  ;;  %v398_v16 = vsel %vm396_vm0, %v1577_v15, 0  ;;  %v1602_v18 = vld [vmem:[%s2205_s1 + $0x8] sm:$0xf]  ;;  %v1914_v20 = vld [vmem:[%s2044_s8 + $0x38] sm:$0xff]   ;;  %v1611_v23 = vld [vmem:[%s2205_s1 + $0xc] sm:$0xf] }
  0x24   : > { %1875 = vmatpush3.bf16.msra.mxu1 %v398_v16  ;;  %1785 = vmatpush3.bf16.msra.mxu0 %v398_v16  ;;  %v1913_v19 = vld [vmem:[%s2044_s8 + $0x28] sm:$0xff]   ;;  %v1915_v21 = vld [vmem:[%s2044_s8 + $0x30] sm:$0xff]   ;;  %v609_v22 = vsel %vm396_vm0, %v1602_v18, 0  ;;  %v1916_v24 = vld [vmem:[%s2044_s8 + $0x40] sm:$0xff]   ;;  %v498_v25 = vsel %vm396_vm0, %v351_v17, 0  ;;  %v727_v33 = vsel %vm396_vm0, %v1611_v23, 0 }
  0x25   : > { %1878 = vmatprep.subr.msk.bf16.mxu1 %vm396_vm0, %v351_v17  ;;  %1879 = vmatprep.subr.msk.bf16.mxu0 %vm396_vm0, %v1602_v18  ;;  %v1628_v26 = vld [vmem:[%s2205_s1 + $0x10] sm:$0xf]  ;;  %v1917_v27 = vld [vmem:[%s2044_s8] sm:$0xff]   ;;  %v1919_v30 = vld [vmem:[%s2044_s8 + $0x8] sm:$0xff]   ;;  %s2213_s15 = smov (!%p2165_p8, %s1560_s15), 1 }
  0x26   : > { %1786 = vmatprep.mubr.msk.bf16.mxu0 %vm383_vm1, %v1913_v19  ;;  %1790 = vmatprep.mubr.msk.bf16.mxu1 %vm383_vm1, %v1914_v20  ;;  %v1918_v28 = vld [vmem:[%s2044_s8 + $0x50] sm:$0xff]   ;;  %v1920_v29 = vld [vmem:[%s2044_s8 + $0x58] sm:$0xff]   ;;  %v845_v31 = vsel %vm396_vm0, %v1628_v26, 0  ;;  %v1922_v34 = vld [vmem:[%s2044_s8 + $0x60] sm:$0xff]   ;;  %s1707_s14 = sshll.u32 %s2213_s15, 5  ;;  %s1568_s30 = sshll.u32 %s2213_s15, 1 }
  0x27   : > { %1787 = vmatmul.mubr.msk.bf16.vlgmr.msra.gmra.mxu0 %vm383_vm1, %v1915_v21  ;;  %1791 = vmatmul.mubr.msk.bf16.vlgmr.msra.gmra.mxu1 %vm383_vm1, %v1916_v24  ;;  %v1921_v32 = vld [vmem:[%s2044_s8 + $0x10] sm:$0xff]   ;;  %v1923_v36 = vld [vmem:[%s2044_s8 + $0x18] sm:$0xff]   ;;  %v1924_v37 = vld [vmem:[%s2044_s8 + $0x68] sm:$0xff]   ;;  %s2183_s29 = scalar_lea.vmem %s2206_s2, %s1707_s14  ;;  %s341_s6 = scalar_lea.vmem %s2207_s3, %s1568_s30 }
  0x28   : > { %1805 = vmatpush3.bf16.msra.mxu0 %v609_v22  ;;  %1795 = vmatpush3.bf16.msra.mxu1 %v498_v25  ;;  %v1645_v35 = vld [vmem:[%s2205_s1 + $0x14] sm:$0xf]  ;;  %v1654_v38 = vld [vmem:[%s2205_s1 + $0x18] sm:$0xf]  ;;  %v1926_v39 = vld [vmem:[%s2044_s8 + $0x2c] sm:$0xff]  }
  0x29   : > { %1796 = vmatprep.mubr.msk.bf16.mxu1 %vm383_vm1, %v1917_v27  ;;  %1806 = vmatprep.mubr.msk.bf16.mxu0 %vm383_vm1, %v1918_v28  ;;  %v1925_v40 = vld [vmem:[%s2044_s8 + $0x4] sm:$0xff]   ;;  %v1928_v41 = vld [vmem:[%s2044_s8 + $0x34] sm:$0xff]   ;;  %v1927_v42 = vld [vmem:[%s2044_s8 + $0xc] sm:$0xff]   ;;  %v1081_v43 = vsel %vm396_vm0, %v1654_v38, 0  ;;  %v963_v45 = vsel %vm396_vm0, %v1645_v35, 0 }
  0x2a   : > { %1880 = vmatprep.subr.msk.bf16.mxu1 %vm396_vm0, %v1611_v23  ;;  %1881 = vmatprep.subr.msk.bf16.mxu0 %vm396_vm0, %v1628_v26  ;;  %v1929_v44 = vld [vmem:[%s2044_s8 + $0x14] sm:$0xff]   ;;  %v1930_v46 = vld [vmem:[%s2044_s8 + $0x3c] sm:$0xff]   ;;  %v1932_v50 = vld [vmem:[%s2044_s8 + $0x44] sm:$0xff]  }
  0x2b   : > { %v1671_v47 = vld [vmem:[%s2205_s1 + $0x1c] sm:$0xf]  ;;  %v1688_v48 = vld [vmem:[%s2205_s1 + $0x20] sm:$0xf]  ;;  %v1933_v52 = vld [vmem:[%s2044_s8 + $0x54] sm:$0xff]  }
  0x2c   : > { %v1931_v49 = vld [vmem:[%s2044_s8 + $0x1c] sm:$0xff]   ;;  %v1934_v51 = vld [vmem:[%s2044_s8 + $0x8] sm:$0xff]   ;;  %v1936_v53 = vld [vmem:[%s2044_s8 + $0x10] sm:$0xff]   ;;  %v1317_v55 = vsel %vm396_vm0, %v1688_v48, 0  ;;  %v1199_v57 = vsel %vm396_vm0, %v1671_v47, 0 }
  0x2d   : > { %v1935_v54 = vld [vmem:[%s2044_s8 + $0x5c] sm:$0xff]   ;;  %v1937_v56 = vld [vmem:[%s2044_s8 + $0x64] sm:$0xff]   ;;  %v1939_v60 = vld [vmem:[%s2044_s8 + $0x6c] sm:$0xff]  }
  0x2e   : > { %v1938_v58 = vld [vmem:[%s2044_s8 + $0x18] sm:$0xff]   ;;  %v1940_v59 = vld [vmem:[%s2044_s8 + $0x20] sm:$0xff]   ;;  %v1941_v62 = vld [vmem:[%s2044_s8 + $0x30] sm:$0xff]  }
  0x2f   : > { %1807 = vmatmul.mubr.msk.bf16.vlgmr.msra.gmra.mxu0 %vm383_vm1, %v1920_v29  ;;  %1797 = vmatmul.mubr.msk.bf16.vlgmr.msra.gmra.mxu1 %vm383_vm1, %v1919_v30  ;;  %v1942_v61 = vld [vmem:[%s2044_s8 + $0x58] sm:$0xff]   ;;  %v1944_v63 = vld [vmem:[%s2044_s8 + $0x60] sm:$0xff]   ;;  %v1946_v1 = vld [vmem:[%s2044_s8 + $0x68] sm:$0xff]  }
  0x30   : > { %1825 = vmatpush3.bf16.msra.mxu0 %v845_v31  ;;  %1815 = vmatpush3.bf16.msra.mxu1 %v727_v33  ;;  %v1943_v0 = vld [vmem:[%s2044_s8 + $0x38] sm:$0xff]   ;;  %v1945_v2 = vld [vmem:[%s2044_s8 + $0x40] sm:$0xff]   ;;  %v1948_v3 = vld [vmem:[%s2044_s8 + $0x70] sm:$0xff]  }
  0x31   : > { %1800 = vmatprep.mubr.msk.bf16.mxu1 %vm383_vm1, %v1921_v32  ;;  %1810 = vmatprep.mubr.msk.bf16.mxu0 %vm383_vm1, %v1922_v34  ;;  %v1947_v4 = vld [vmem:[%s2044_s8 + $0x48] sm:$0xff]  }
  0x32   : > { %1882 = vmatprep.subr.msk.bf16.mxu1 %vm396_vm0, %v1645_v35  ;;  %1883 = vmatprep.subr.msk.bf16.mxu0 %vm396_vm0, %v1654_v38 }
  0x37   : > { %1811 = vmatmul.mubr.msk.bf16.gmra.mxu0 %vm383_vm1, %v1924_v37  ;;  %1801 = vmatmul.mubr.msk.bf16.gmra.mxu1 %vm383_vm1, %v1923_v36 }
  0x38   : > { %1826 = vmatprep.mubr.msk.bf16.mxu0 %vm383_vm1, %v1926_v39  ;;  %1816 = vmatprep.mubr.msk.bf16.mxu1 %vm383_vm1, %v1925_v40 }
  0x3f   : > { %1827 = vmatmul.mubr.msk.bf16.vlgmr.msra.gmra.mxu0 %vm383_vm1, %v1928_v41  ;;  %1817 = vmatmul.mubr.msk.bf16.vlgmr.msra.gmra.mxu1 %vm383_vm1, %v1927_v42 }
  0x40   : > { %1845 = vmatpush3.bf16.msra.mxu0 %v1081_v43  ;;  %1835 = vmatpush3.bf16.msra.mxu1 %v963_v45 }
  0x41   : > { %1820 = vmatprep.mubr.msk.bf16.mxu1 %vm383_vm1, %v1929_v44  ;;  %1830 = vmatprep.mubr.msk.bf16.mxu0 %vm383_vm1, %v1930_v46 }
  0x42   : > { %1884 = vmatprep.subr.msk.bf16.mxu1 %vm396_vm0, %v1671_v47  ;;  %1885 = vmatprep.subr.msk.bf16.mxu0 %vm396_vm0, %v1688_v48 }
  0x47   : > { %1831 = vmatmul.mubr.msk.bf16.gmra.mxu0 %vm383_vm1, %v1932_v50  ;;  %1821 = vmatmul.mubr.msk.bf16.gmra.mxu1 %vm383_vm1, %v1931_v49 }
  0x48   : > { %1846 = vmatprep.mubr.msk.bf16.mxu0 %vm383_vm1, %v1934_v51  ;;  %1836 = vmatprep.mubr.msk.bf16.mxu1 %vm383_vm1, %v1933_v52 }
  0x4f   : > { %1847 = vmatmul.mubr.msk.bf16.vlgmr.msra.gmra.mxu0 %vm383_vm1, %v1936_v53  ;;  %1837 = vmatmul.mubr.msk.bf16.vlgmr.msra.gmra.mxu1 %vm383_vm1, %v1935_v54 }
  0x50   : > { %1865 = vmatpush3.bf16.msra.mxu0 %v1317_v55  ;;  %1855 = vmatpush3.bf16.msra.mxu1 %v1199_v57 }
  0x51   : > { %1840 = vmatprep.mubr.msk.bf16.mxu1 %vm383_vm1, %v1937_v56  ;;  %1850 = vmatprep.mubr.msk.bf16.mxu0 %vm383_vm1, %v1938_v58 }
  0x57   : > { %1851 = vmatmul.mubr.msk.bf16.gmra.mxu0 %vm383_vm1, %v1940_v59  ;;  %1841 = vmatmul.mubr.msk.bf16.gmra.mxu1 %vm383_vm1, %v1939_v60 }
  0x58   : > { %1866 = vmatprep.mubr.msk.bf16.mxu0 %vm383_vm1, %v1942_v61  ;;  %1856 = vmatprep.mubr.msk.bf16.mxu1 %vm383_vm1, %v1941_v62 }
  0x5f   : > { %1867 = vmatmul.mubr.msk.bf16.vlgmr.msra.gmra.mxu0 %vm383_vm1, %v1944_v63  ;;  %1857 = vmatmul.mubr.msk.bf16.vlgmr.msra.gmra.mxu1 %vm383_vm1, %v1943_v0 }
  0x60   : > { %1870 = vmatprep.mubr.msk.bf16.mxu0 %vm383_vm1, %v1946_v1  ;;  %1860 = vmatprep.mubr.msk.bf16.mxu1 %vm383_vm1, %v1945_v2 }
  0x67   : > { %1871 = vmatmul.mubr.msk.bf16.gmra.mxu0 %vm383_vm1, %v1948_v3  ;;  %1861 = vmatmul.mubr.msk.bf16.gmra.mxu1 %vm383_vm1, %v1947_v4 }
  0xe7   : > { %v1788_v5 = vpop.f32.mrf.mxu0  ;;  %v1792_v6 = vpop.f32.mrf.mxu1 }
  0xe9   : > { %v434_v7 = vpop.f32.mrf.mxu0  ;;  %v450_v8 = vpop.f32.mrf.mxu1 }
  0xeb   : > { %v1789_v9 = vpop.f32.mrf.mxu0  ;;  %v1793_v10 = vpop.f32.mrf.mxu1 }
  0xed   : > { %v437_v11 = vpop.f32.mrf.mxu0  ;;  %v2150_v12 = vpop.f32.mrf.mxu1 }
  0xef   : > { %v1808_v13 = vpop.f32.mrf.mxu0  ;;  %v1798_v14 = vpop.f32.mrf.mxu1 }
  0xf0   : > { %v543_v47 = vadd.f32 %v1798_v14, %v1788_v5 }
  0xf1   : > { %v645_v15 = vpop.f32.mrf.mxu0  ;;  %v534_v16 = vpop.f32.mrf.mxu1 }
  0xf2   : > { %v535_v48 = vadd.f32 %v534_v16, %v434_v7  ;;  %v678_v54 = vadd.f32 %v1808_v13, %v543_v47 }
  0xf3   : > { %v1809_v17 = vpop.f32.mrf.mxu0  ;;  %v1799_v18 = vpop.f32.mrf.mxu1 }
  0xf4   : > { %v546_v51 = vadd.f32 %v1799_v18, %v1789_v9  ;;  %v676_v55 = vadd.f32 %v645_v15, %v535_v48 }
  0xf5   : > { %v648_v19 = vpop.f32.mrf.mxu0  ;;  %v537_v20 = vpop.f32.mrf.mxu1 }
  0xf6   : > { %v538_v56 = vadd.f32 %v537_v20, %v437_v11  ;;  %v679_v59 = vadd.f32 %v1809_v17, %v546_v51 }
  0xf7   : > { %v1812_v21 = vpop.f32.mrf.mxu0  ;;  %v1802_v22 = vpop.f32.mrf.mxu1 }
  0xf8   : > { %v559_v63 = vadd.f32 %v1802_v22, %v1792_v6  ;;  %v677_v1 = vadd.f32 %v648_v19, %v538_v56 }
  0xf9   : > { %v661_v23 = vpop.f32.mrf.mxu0  ;;  %v550_v24 = vpop.f32.mrf.mxu1 }
  0xfa   : > { %v551_v4 = vadd.f32 %v550_v24, %v450_v8  ;;  %v682_v15 = vadd.f32 %v1812_v21, %v559_v63 }
  0xfb   : > { %v1813_v25 = vpop.f32.mrf.mxu0  ;;  %v1803_v26 = vpop.f32.mrf.mxu1 }
  0xfc   : > { %v562_v5 = vadd.f32 %v1803_v26, %v1793_v10  ;;  %v680_v8 = vadd.f32 %v661_v23, %v551_v4 }
  0xfd   : > { %v2152_v27 = vpop.f32.mrf.mxu0  ;;  %v553_v28 = vpop.f32.mrf.mxu1 }
  0xfe   : > { %v554_v16 = vadd.f32 %v553_v28, %v2150_v12  ;;  %v683_v10 = vadd.f32 %v1813_v25, %v562_v5 }
  0xff   : > { %v1828_v29 = vpop.f32.mrf.mxu0  ;;  %v1818_v30 = vpop.f32.mrf.mxu1 }
 0x100   : > { %v796_v60 = vadd.f32 %v1818_v30, %v678_v54  ;;  %v681_v12 = vadd.f32 %v2152_v27, %v554_v16 }
 0x101   : > { %v881_v31 = vpop.f32.mrf.mxu0  ;;  %v763_v32 = vpop.f32.mrf.mxu1 }
 0x102   : > { %v794_v61 = vadd.f32 %v763_v32, %v676_v55  ;;  %v914_v9 = vadd.f32 %v1828_v29, %v796_v60 }
 0x103   : > { %v1829_v33 = vpop.f32.mrf.mxu0  ;;  %v1819_v34 = vpop.f32.mrf.mxu1 }
 0x104   : > { %v797_v2 = vadd.f32 %v1819_v34, %v679_v59  ;;  %v912_v13 = vadd.f32 %v881_v31, %v794_v61 }
 0x105   : > { %v884_v35 = vpop.f32.mrf.mxu0  ;;  %v766_v36 = vpop.f32.mrf.mxu1 }
 0x106   : > { %v795_v14 = vadd.f32 %v766_v36, %v677_v1  ;;  %v915_v18 = vadd.f32 %v1829_v33, %v797_v2 }
 0x107   : > { %v1832_v37 = vpop.f32.mrf.mxu0  ;;  %v1822_v38 = vpop.f32.mrf.mxu1 }
 0x108   : > { %v800_v19 = vadd.f32 %v1822_v38, %v682_v15  ;;  %v913_v26 = vadd.f32 %v884_v35, %v795_v14 }
 0x109   : > { %v2154_v39 = vpop.f32.mrf.mxu0  ;;  %v779_v40 = vpop.f32.mrf.mxu1 }
 0x10a   : > { %v798_v28 = vadd.f32 %v779_v40, %v680_v8  ;;  %v918_v23 = vadd.f32 %v1832_v37, %v800_v19 }
 0x10b   : > { %v2156_v41 = vpop.f32.mrf.mxu0  ;;  %v1823_v42 = vpop.f32.mrf.mxu1 }
 0x10c   : > { %v801_v30 = vadd.f32 %v1823_v42, %v683_v10  ;;  %v916_v27 = vadd.f32 %v2154_v39, %v798_v28 }
 0x10d   : > { %v2158_v43 = vpop.f32.mrf.mxu0  ;;  %v782_v44 = vpop.f32.mrf.mxu1 }
 0x10e   : > { %v799_v25 = vadd.f32 %v782_v44, %v681_v12  ;;  %v919_v40 = vadd.f32 %v2156_v41, %v801_v30 }
 0x10f   : > { %v1848_v45 = vpop.f32.mrf.mxu0  ;;  %v1838_v46 = vpop.f32.mrf.mxu1 }
 0x110   : > { %v1032_v20 = vadd.f32 %v1838_v46, %v914_v9 }
 0x111   : > { %v1117_v49 = vpop.f32.mrf.mxu0  ;;  %v999_v50 = vpop.f32.mrf.mxu1 }
 0x112   : > { %v1030_v6 = vadd.f32 %v999_v50, %v912_v13  ;;  %v1150_v32 = vadd.f32 %v1848_v45, %v1032_v20 }
 0x113   : > { %v1849_v52 = vpop.f32.mrf.mxu0  ;;  %v1839_v53 = vpop.f32.mrf.mxu1 }
 0x114   : > { %v1033_v21 = vadd.f32 %v1839_v53, %v915_v18  ;;  %v1148_v33 = vadd.f32 %v1117_v49, %v1030_v6  ;;  %v917_v53 = vadd.f32 %v2158_v43, %v799_v25 }
 0x115   : > { %v1120_v57 = vpop.f32.mrf.mxu0  ;;  %v1002_v58 = vpop.f32.mrf.mxu1 }
 0x116   : > { %v1031_v34 = vadd.f32 %v1002_v58, %v913_v26  ;;  %v1151_v35 = vadd.f32 %v1849_v52, %v1033_v21 }
 0x117   : > { %v1852_v62 = vpop.f32.mrf.mxu0  ;;  %v1842_v0 = vpop.f32.mrf.mxu1 }
 0x118   : > { %v1036_v42 = vadd.f32 %v1842_v0, %v918_v23  ;;  %v1149_v49 = vadd.f32 %v1120_v57, %v1031_v34 }
 0x119   : > { %v2160_v3 = vpop.f32.mrf.mxu0  ;;  %v1015_v7 = vpop.f32.mrf.mxu1 }
 0x11a   : > { %v1034_v54 = vadd.f32 %v1015_v7, %v916_v27  ;;  %v1154_v60 = vadd.f32 %v1852_v62, %v1036_v42 }
 0x11b   : > { %v1853_v11 = vpop.f32.mrf.mxu0  ;;  %v1843_v17 = vpop.f32.mrf.mxu1 }
 0x11c   : > { %v1037_v37 = vadd.f32 %v1843_v17, %v919_v40  ;;  %v1152_v63 = vadd.f32 %v2160_v3, %v1034_v54 }
 0x11d   : > { %v1136_v22 = vpop.f32.mrf.mxu0  ;;  %v1018_v24 = vpop.f32.mrf.mxu1 }
 0x11e   : > { %v1035_v39 = vadd.f32 %v1018_v24, %v917_v53  ;;  %v1155_v0 = vadd.f32 %v1853_v11, %v1037_v37 }
 0x11f   : > { %v1868_v29 = vpop.f32.mrf.mxu0  ;;  %v1858_v31 = vpop.f32.mrf.mxu1 }
 0x120   : > { %v1268_v46 = vadd.f32 %v1858_v31, %v1150_v32  ;;  %v1153_v9 = vadd.f32 %v1136_v22, %v1035_v39 }
 0x121   : > { %v1353_v36 = vpop.f32.mrf.mxu0  ;;  %v1235_v38 = vpop.f32.mrf.mxu1 }
 0x122   : > { %v1266_v47 = vadd.f32 %v1235_v38, %v1148_v33  ;;  %v1386_v55 = vadd.f32 %v1868_v29, %v1268_v46 }
 0x123   : > { %v1869_v48 = vpop.f32.mrf.mxu0  ;;  %v1859_v45 = vpop.f32.mrf.mxu1 }
 0x124   : > { %v1269_v50 = vadd.f32 %v1859_v45, %v1151_v35  ;;  %v1384_v52 = vadd.f32 %v1353_v36, %v1266_v47  ;;  %v1408_v15 = vmul.f32 %v1386_v55, %v1386_v55 }
 0x125   : > { %v1356_v51 = vpop.f32.mrf.mxu0  ;;  %v1238_v44 = vpop.f32.mrf.mxu1 }
 0x126   : > { %v1387_v56 = vadd.f32 %v1869_v48, %v1269_v50  ;;  %v1267_v58 = vadd.f32 %v1238_v44, %v1149_v49  ;;  %v1406_v4 = vmul.f32 %v1384_v52, %v1384_v52 }
 0x127   : > { %v1872_v59 = vpop.f32.mrf.mxu0  ;;  %v1862_v41 = vpop.f32.mrf.mxu1 }
 0x128   : > { %v1724_v57 = vpack.c.bf16 %v1387_v56, %v1386_v55  ;;  %v1385_v61 = vadd.f32 %v1356_v51, %v1267_v58  ;;  %v1272_v1 = vadd.f32 %v1862_v41, %v1154_v60  ;;  %v1409_v6 = vmul.f32 %v1387_v56, %v1387_v56 }
 0x129   : > { %v1369_v43 = vpop.f32.mrf.mxu0  ;;  %v1251_v2 = vpop.f32.mrf.mxu1 }
 0x12a   : > { %1736 = vst [vmem:[%s2183_s29 + $0x8] sm:$0xff] %v1724_v57   ;;  %v1392_v62 = vadd.f32 %v1385_v61, %v1384_v52  ;;  %v1407_v5 = vmul.f32 %v1385_v61, %v1385_v61  ;;  %v1719_v7 = vpack.c.bf16 %v1385_v61, %v1384_v52  ;;  %v1270_v13 = vadd.f32 %v1251_v2, %v1152_v63 }
 0x12b   : > { %v1863_v14 = vpop.f32.mrf.mxu1  ;;  %v1873_v20 = vpop.f32.mrf.mxu0  ;;  %v1390_v3 = vadd.f32 %v1872_v59, %v1272_v1 }
 0x12c   : > { %v1393_v16 = vadd.f32 %v1392_v62, %v1386_v55  ;;  %v1414_v17 = vadd.f32 %v1407_v5, %v1406_v4  ;;  %1720 = vst [vmem:[%s2183_s29] sm:$0xff] %v1719_v7   ;;  %v1273_v18 = vadd.f32 %v1863_v14, %v1155_v0  ;;  %v1388_v11 = vadd.f32 %v1369_v43, %v1270_v13 }
 0x12d   : > { %v1254_v8 = vpop.f32.mrf.mxu1  ;;  %v1372_v28 = vpop.f32.mrf.mxu0  ;;  %v1412_v36 = vmul.f32 %v1390_v3, %v1390_v3 }
 0x12e   : > { %v1415_v10 = vadd.f32 %v1414_v17, %v1408_v15  ;;  %v1394_v19 = vadd.f32 %v1393_v16, %v1387_v56  ;;  %v1391_v24 = vadd.f32 %v1873_v20, %v1273_v18  ;;  %v1271_v26 = vadd.f32 %v1254_v8, %v1153_v9 }
 0x12f   : > { %v1410_v22 = vmul.f32 %v1388_v11, %v1388_v11 }
 0x130   : > { %v1395_v21 = vadd.f32 %v1394_v19, %v1388_v11  ;;  %v1416_v29 = vadd.f32 %v1415_v10, %v1409_v6  ;;  %v1734_v12 = vpack.c.bf16 %v1391_v24, %v1390_v3  ;;  %v1389_v30 = vadd.f32 %v1372_v28, %v1271_v26 }
 0x131   : > { %v1413_v38 = vmul.f32 %v1391_v24, %v1391_v24 }
 0x132   : > { %v1417_v31 = vadd.f32 %v1416_v29, %v1410_v22  ;;  %1738 = vst [vmem:[%s2183_s29 + $0x18] sm:$0xff] %v1734_v12   ;;  %v1396_v32 = vadd.f32 %v1395_v21, %v1389_v30  ;;  %v1411_v33 = vmul.f32 %v1389_v30, %v1389_v30  ;;  %v1729_v34 = vpack.c.bf16 %v1389_v30, %v1388_v11 }
 0x134   : > { %v1397_v23 = vadd.f32 %v1396_v32, %v1390_v3  ;;  %v1418_v25 = vadd.f32 %v1417_v31, %v1411_v33  ;;  %1737 = vst [vmem:[%s2183_s29 + $0x10] sm:$0xff] %v1729_v34  }
 0x136   : > { %v1398_v35 = vadd.f32 %v1397_v23, %v1391_v24  ;;  %v1419_v46 = vadd.f32 %v1418_v25, %v1412_v36 }
 0x138   : > { %v1399_v47 = vrot.slane %v1398_v35, 4  ;;  %v1420_v48 = vadd.f32 %v1419_v46, %v1413_v38 }
 0x13a   : > { %v1400_v27 = vadd.f32 %v1399_v47, %v1398_v35  ;;  %v1421_v40 = vrot.slane %v1420_v48, 4 }
 0x13c   : > { %v1401_v42 = vrot.slane %v1400_v27, 2  ;;  %v1422_v45 = vadd.f32 %v1421_v40, %v1420_v48 }
 0x13e   : > { %v1402_v49 = vadd.f32 %v1401_v42, %v1400_v27  ;;  %v1423_v50 = vrot.slane %v1422_v45, 2 }
 0x140   : > { %v1403_v51 = vrot.slane %v1402_v49, 1  ;;  %v1424_v53 = vadd.f32 %v1423_v50, %v1422_v45 }
 0x142   : > { %v1404_v54 = vadd.f32 %v1403_v51, %v1402_v49  ;;  %v1425_v37 = vrot.slane %v1424_v53, 1 }
 0x144   : > { %1405 = vst [vmem:[%s341_s6] sm:$0x1] %v1404_v54  ;;  %v1426_v44 = vadd.f32 %v1425_v37, %v1424_v53 }
 0x146   : > { %1427 = vst [vmem:[%s341_s6 + $0x1] sm:$0x1] %v1426_v44 }
 0x147 PF: > { %p11_p9 = scmp.ge.s32.totalorder %s2010_s16, 4   ;;  %s2209_s12 = smov %s1967_s13 }
 0x148   : > { %s2210_s13 = smov %s2019_s19  ;;  %s2211_s14 = smov %s2010_s16 }
 0x149   :  { %13 = sbr.rel (!%p11_p9) target bundleno = 2 (0x2), region = 126 }

</bundles_post_ra>
